<compile_context>
chip_gen: v7x
topology: tpu7x:2x2x1
jax: 0.10.0
libtpu: 0.0.40
codegen_flags: <defaults>
</compile_context>

<pallas_src>
import jax
import jax.numpy as jnp
from jax import lax
from jax.experimental import pallas as pl
from jax.experimental.pallas import tpu as pltpu

EPS = 1e-5  # nn.BatchNorm2d default eps


def _banded_conv_weight(w, W):
    """(3, 3, Cin, Co) tap weights -> (3, W*Cin, W*Co) per-kh banded matrices.

    band[kh][wp*Cin + ci, wo*Co + co] = w[kh, wp - wo + 1, ci, co] when
    0 <= wp - wo + 1 <= 2, else 0.  The horizontal taps (kw) and the width-1
    zero padding are folded into the weight operand, so the whole horizontal
    part of the conv becomes one lane-dense matmul per kernel row.
    """
    _, _, cin, co = w.shape
    wp = jnp.arange(W)[:, None]                       # source W position
    wo = jnp.arange(W)[None, :]                       # output W position
    kw = wp - wo + 1                                  # (W, W)
    valid = (kw >= 0) & (kw <= 2)
    taps = w[:, jnp.clip(kw, 0, 2)]                   # (3, W, W, Cin, Co)
    taps = jnp.where(valid[None, :, :, None, None], taps, 0.0)
    return jnp.transpose(taps, (0, 1, 3, 2, 4)).reshape(3, W * cin, W * co)


def _preact_block_kernel(x_ref, g1_ref, b1_ref, fold1_ref, spread1_ref,
                         wb1_ref, wsc_ref, g2_ref, b2_ref, fold2_ref,
                         spread2_ref, wb2_ref, sup_ref, sdn_ref, out_ref):
    """Whole pre-activation block, grid=(1,), lane-dense slabs.

    x_ref      : (R, W*Ci)       R = N*H
    g1/b1      : (1, Ci)         BN1 gamma/beta
    fold1      : (W*Ci, Ci)      per-lane -> per-channel fold
    spread1    : (Ci, W*Ci)      per-channel -> per-lane spread
    wb1        : (3, W*Ci, W*Co) conv1 banded weights (one per kh)
    wsc        : (W*Ci, W*Co)    1x1 shortcut conv, block-diagonal
    g2/b2/fold2/spread2/wb2      same, with Co channels
    s_up/s_dn  : (R, R)          h-1 / h+1 shift matrices (sample-boundary
                                 zero padding baked in)
    out_ref    : (R, W*Co)       lane-dense output slab
    """
    R, LCi = x_ref.shape
    Ci = g1_ref.shape[1]
    W = LCi // Ci
    inv_m = 1.0 / float(R * W)            # 1 / (N*H*W)
    f32 = jnp.float32

    def bn_relu(t, fold_ref, spread_ref, g_ref, b_ref):
        # Training-mode BatchNorm (biased batch variance), single pass:
        # per-lane sum / sum-of-squares, folded to per-channel on the MXU,
        # then the affine scale/shift is spread back to lanes.
        lane_sum = jnp.sum(t, axis=0, keepdims=True)
        lane_sq = jnp.sum(t * t, axis=0, keepdims=True)
        csum = jnp.dot(lane_sum, fold_ref[...], preferred_element_type=f32)
        csq = jnp.dot(lane_sq, fold_ref[...], preferred_element_type=f32)
        mean = csum * inv_m
        var = csq * inv_m - mean * mean
        scale_c = g_ref[...] * lax.rsqrt(var + EPS)
        shift_c = b_ref[...] - mean * scale_c
        scale = jnp.dot(scale_c, spread_ref[...], preferred_element_type=f32)
        shift = jnp.dot(shift_c, spread_ref[...], preferred_element_type=f32)
        return jnp.maximum(t * scale + shift, 0.0)

    def conv3x3(p, wb_ref):
        # Vertical taps via tiny shift matmuls (height padding + per-sample
        # boundaries already baked into s_up/s_dn); horizontal taps + width
        # padding are folded into the banded weights -> 3 matmuls per conv.
        up = jnp.dot(sup_ref[...], p, preferred_element_type=f32)   # row h-1
        dn = jnp.dot(sdn_ref[...], p, preferred_element_type=f32)   # row h+1
        return (jnp.dot(up, wb_ref[0], preferred_element_type=f32)
                + jnp.dot(p, wb_ref[1], preferred_element_type=f32)
                + jnp.dot(dn, wb_ref[2], preferred_element_type=f32))

    x = x_ref[...]

    # ---- BN1 + ReLU -------------------------------------------------------
    p1 = bn_relu(x, fold1_ref, spread1_ref, g1_ref, b1_ref)      # (R, W*Ci)

    # ---- shortcut (1x1 conv on p1), accumulated right after p1 is formed --
    acc = jnp.dot(p1, wsc_ref[...], preferred_element_type=f32)  # (R, W*Co)

    # ---- conv1 ------------------------------------------------------------
    h1 = conv3x3(p1, wb1_ref)                                    # (R, W*Co)

    # ---- BN2 + ReLU -------------------------------------------------------
    p2 = bn_relu(h1, fold2_ref, spread2_ref, g2_ref, b2_ref)

    # ---- conv2 + residual add; single lane-dense (R, 128) store -----------
    out_ref[...] = (acc + conv3x3(p2, wb2_ref)).astype(out_ref.dtype)


def preact_block_forward(x_nchw, params):
    """Wrapper: NCHW in -> NCHW out; layout plumbing here, compute in Pallas."""
    N, Ci, H, W = x_nchw.shape
    Co = params["w1"].shape[0]
    R = N * H
    LCi, LCo = W * Ci, W * Co
    f32 = jnp.float32

    # activations: NCHW -> NHWC -> lane-dense slab (N*H, W*Ci)
    x_slab = jnp.transpose(x_nchw, (0, 2, 3, 1)).astype(f32).reshape(R, LCi)

    # conv weights: OIHW -> (kh, kw, ci, co) -> banded per-kh matrices
    w1 = jnp.transpose(params["w1"], (2, 3, 1, 0)).astype(f32)   # (3,3,Ci,Co)
    w2 = jnp.transpose(params["w2"], (2, 3, 1, 0)).astype(f32)   # (3,3,Co,Co)
    wsc = jnp.transpose(params["w_sc"], (2, 3, 1, 0)).reshape(Ci, Co).astype(f32)

    wb1 = _banded_conv_weight(w1, W)                             # (3, W*Ci, W*Co)
    wb2 = _banded_conv_weight(w2, W)                             # (3, W*Co, W*Co)
    wsc_blk = jnp.kron(jnp.eye(W, dtype=f32), wsc)               # (W*Ci, W*Co)

    # per-channel <-> per-lane fold / spread operators
    spread1 = jnp.kron(jnp.ones((1, W), f32), jnp.eye(Ci, dtype=f32))  # (Ci, W*Ci)
    spread2 = jnp.kron(jnp.ones((1, W), f32), jnp.eye(Co, dtype=f32))  # (Co, W*Co)
    fold1 = spread1.T                                            # (W*Ci, Ci)
    fold2 = spread2.T                                            # (W*Co, Co)

    # vertical (h +/- 1) shift matrices with per-sample zero padding baked in
    r = jnp.arange(R)
    h = r % H
    s_up = ((r[:, None] - 1 == r[None, :]) & (h[:, None] != 0)).astype(f32)
    s_dn = ((r[:, None] + 1 == r[None, :]) & (h[:, None] != H - 1)).astype(f32)

    g1 = params["gamma1"].reshape(1, Ci).astype(f32)
    b1 = params["beta1"].reshape(1, Ci).astype(f32)
    g2 = params["gamma2"].reshape(1, Co).astype(f32)
    b2 = params["beta2"].reshape(1, Co).astype(f32)

    def fs(shape):  # full-array BlockSpec for grid=(1,)
        z = (0,) * len(shape)
        return pl.BlockSpec(shape, lambda i, z=z: z)

    out_slab = pl.pallas_call(
        _preact_block_kernel,
        out_shape=jax.ShapeDtypeStruct((R, LCo), f32),
        grid_spec=pltpu.PrefetchScalarGridSpec(
            num_scalar_prefetch=0,
            grid=(1,),
            in_specs=[
                fs((R, LCi)),                       # x
                fs((1, Ci)), fs((1, Ci)),           # gamma1, beta1
                fs((LCi, Ci)), fs((Ci, LCi)),       # fold1, spread1
                fs((3, LCi, LCo)),                  # wb1
                fs((LCi, LCo)),                     # w_sc (block-diag)
                fs((1, Co)), fs((1, Co)),           # gamma2, beta2
                fs((LCo, Co)), fs((Co, LCo)),       # fold2, spread2
                fs((3, LCo, LCo)),                  # wb2
                fs((R, R)), fs((R, R)),             # s_up, s_dn
            ],
            out_specs=fs((R, LCo)),
        ),
        compiler_params=pltpu.CompilerParams(dimension_semantics=("arbitrary",)),
    )(x_slab, g1, b1, fold1, spread1, wb1, wsc_blk,
      g2, b2, fold2, spread2, wb2, s_up, s_dn)

    # (N*H, W*Co) -> NHWC -> NCHW
    return jnp.transpose(out_slab.reshape(N, H, W, Co), (0, 3, 1, 2))


def _ref_forward(x_nchw, params):
    """Pure-JAX reference (training-mode BN, same semantics as the kernel)."""
    Ci = x_nchw.shape[1]
    Co = params["w1"].shape[0]
    x = jnp.transpose(x_nchw, (0, 2, 3, 1)).astype(jnp.float32)

    def bn_relu(t, g, b):
        m = jnp.mean(t, axis=(0, 1, 2), keepdims=True)
        v = jnp.mean((t - m) ** 2, axis=(0, 1, 2), keepdims=True)
        return jnp.maximum((t - m) * lax.rsqrt(v + EPS) * g + b, 0.0)

    p1 = bn_relu(x, params["gamma1"].reshape(1, 1, 1, Ci),
                 params["beta1"].reshape(1, 1, 1, Ci))
    wsc = jnp.transpose(params["w_sc"], (2, 3, 1, 0)).reshape(Ci, Co)
    shortcut = jnp.einsum("nhwc,co->nhwo", p1, wsc)

    w1 = jnp.transpose(params["w1"], (2, 3, 1, 0))  # HWIO
    h1 = lax.conv_general_dilated(p1, w1, (1, 1), ((1, 1), (1, 1)),
                                  dimension_numbers=("NHWC", "HWIO", "NHWC"))
    p2 = bn_relu(h1, params["gamma2"].reshape(1, 1, 1, Co),
                 params["beta2"].reshape(1, 1, 1, Co))
    w2 = jnp.transpose(params["w2"], (2, 3, 1, 0))
    h2 = lax.conv_general_dilated(p2, w2, (1, 1), ((1, 1), (1, 1)),
                                  dimension_numbers=("NHWC", "HWIO", "NHWC"))
    return jnp.transpose(h2 + shortcut, (0, 3, 1, 2))


if __name__ == "__main__":
    in_slices, slices = 4, 8   # in_slices != slices -> 1x1 shortcut conv is active
    N, H, W = 2, 16, 16

    key = jax.random.PRNGKey(0)
    ks = jax.random.split(key, 8)
    params = {
        "gamma1": 1.0 + 0.1 * jax.random.normal(ks[0], (in_slices,), jnp.float32),
        "beta1": 0.1 * jax.random.normal(ks[1], (in_slices,), jnp.float32),
        "w1": 0.2 * jax.random.normal(ks[2], (slices, in_slices, 3, 3), jnp.float32),
        "gamma2": 1.0 + 0.1 * jax.random.normal(ks[3], (slices,), jnp.float32),
        "beta2": 0.1 * jax.random.normal(ks[4], (slices,), jnp.float32),
        "w2": 0.2 * jax.random.normal(ks[5], (slices, slices, 3, 3), jnp.float32),
        "w_sc": 0.2 * jax.random.normal(ks[6], (slices, in_slices, 1, 1), jnp.float32),
    }
    x = jax.random.normal(ks[7], (N, in_slices, H, W), jnp.float32)

    out = preact_block_forward(x, params)
    out = jax.block_until_ready(out)

    ref = jax.block_until_ready(_ref_forward(x, params))
    assert out.shape == (N, slices, H, W), out.shape
    assert jnp.allclose(out, ref, rtol=1e-3, atol=1e-3), float(
        jnp.max(jnp.abs(out - ref)))

    print("KERNEL_OK")
</pallas_src>

<mosaic_0001>
module attributes {stable_mosaic.version = 11 : i64} {
  func.func @_preact_block_kernel(%arg0: i32, %arg1: memref<32x64xf32, #tpu.memory_space<vmem>>, %arg2: memref<1x4xf32, #tpu.memory_space<vmem>>, %arg3: memref<1x4xf32, #tpu.memory_space<vmem>>, %arg4: memref<64x4xf32, #tpu.memory_space<vmem>>, %arg5: memref<4x64xf32, #tpu.memory_space<vmem>>, %arg6: memref<3x64x128xf32, #tpu.memory_space<vmem>>, %arg7: memref<64x128xf32, #tpu.memory_space<vmem>>, %arg8: memref<1x8xf32, #tpu.memory_space<vmem>>, %arg9: memref<1x8xf32, #tpu.memory_space<vmem>>, %arg10: memref<128x8xf32, #tpu.memory_space<vmem>>, %arg11: memref<8x128xf32, #tpu.memory_space<vmem>>, %arg12: memref<3x128x128xf32, #tpu.memory_space<vmem>>, %arg13: memref<32x32xf32, #tpu.memory_space<vmem>>, %arg14: memref<32x32xf32, #tpu.memory_space<vmem>>, %arg15: memref<32x128xf32, #tpu.memory_space<vmem>>) attributes {dimension_semantics = [#tpu.dimension_semantics<arbitrary>], iteration_bounds = array<i64: 1>, scalar_prefetch = 0 : i64, scratch_operands = 0 : i64, tpu.core_type = #tpu.core_type<tc>, window_params = [{pipeline_mode = #tpu.pipeline_mode<synchronous>, transform_indices = @transform_0, window_bounds = array<i64: 32, 64>}, {pipeline_mode = #tpu.pipeline_mode<synchronous>, transform_indices = @transform_1, window_bounds = array<i64: 1, 4>}, {pipeline_mode = #tpu.pipeline_mode<synchronous>, transform_indices = @transform_2, window_bounds = array<i64: 1, 4>}, {pipeline_mode = #tpu.pipeline_mode<synchronous>, transform_indices = @transform_3, window_bounds = array<i64: 64, 4>}, {pipeline_mode = #tpu.pipeline_mode<synchronous>, transform_indices = @transform_4, window_bounds = array<i64: 4, 64>}, {pipeline_mode = #tpu.pipeline_mode<synchronous>, transform_indices = @transform_5, window_bounds = array<i64: 3, 64, 128>}, {pipeline_mode = #tpu.pipeline_mode<synchronous>, transform_indices = @transform_6, window_bounds = array<i64: 64, 128>}, {pipeline_mode = #tpu.pipeline_mode<synchronous>, transform_indices = @transform_7, window_bounds = array<i64: 1, 8>}, {pipeline_mode = #tpu.pipeline_mode<synchronous>, transform_indices = @transform_8, window_bounds = array<i64: 1, 8>}, {pipeline_mode = #tpu.pipeline_mode<synchronous>, transform_indices = @transform_9, window_bounds = array<i64: 128, 8>}, {pipeline_mode = #tpu.pipeline_mode<synchronous>, transform_indices = @transform_10, window_bounds = array<i64: 8, 128>}, {pipeline_mode = #tpu.pipeline_mode<synchronous>, transform_indices = @transform_11, window_bounds = array<i64: 3, 128, 128>}, {pipeline_mode = #tpu.pipeline_mode<synchronous>, transform_indices = @transform_12, window_bounds = array<i64: 32, 32>}, {pipeline_mode = #tpu.pipeline_mode<synchronous>, transform_indices = @transform_13, window_bounds = array<i64: 32, 32>}, {pipeline_mode = #tpu.pipeline_mode<synchronous>, transform_indices = @transform_14, window_bounds = array<i64: 32, 128>}]} {
    %c0 = arith.constant 0 : index
    %c0_0 = arith.constant 0 : index
    %0 = vector.load %arg1[%c0, %c0_0] : memref<32x64xf32, #tpu.memory_space<vmem>>, vector<32x64xf32>
    %cst = arith.constant dense<0.000000e+00> : vector<64xf32>
    %1 = vector.multi_reduction <add>, %0, %cst [0] : vector<32x64xf32> to vector<64xf32>
    %2 = vector.shape_cast %1 : vector<64xf32> to vector<1x64xf32>
    %3 = arith.mulf %0, %0 : vector<32x64xf32>
    %cst_1 = arith.constant dense<0.000000e+00> : vector<64xf32>
    %4 = vector.multi_reduction <add>, %3, %cst_1 [0] : vector<32x64xf32> to vector<64xf32>
    %5 = vector.shape_cast %4 : vector<64xf32> to vector<1x64xf32>
    %c0_2 = arith.constant 0 : index
    %c0_3 = arith.constant 0 : index
    %6 = vector.load %arg4[%c0_2, %c0_3] : memref<64x4xf32, #tpu.memory_space<vmem>>, vector<64x4xf32>
    %cst_4 = arith.constant dense<0.000000e+00> : vector<1x4xf32>
    %7 = tpu.matmul %2, %6, %cst_4 {dimension_numbers = #tpu.dot_dimension_numbers<[1], [0], [0], [1], [0, 0, 1, 1], [], []>} : vector<1x64xf32>, vector<64x4xf32>, vector<1x4xf32> -> vector<1x4xf32>
    %c0_5 = arith.constant 0 : index
    %c0_6 = arith.constant 0 : index
    %8 = vector.load %arg4[%c0_5, %c0_6] : memref<64x4xf32, #tpu.memory_space<vmem>>, vector<64x4xf32>
    %cst_7 = arith.constant dense<0.000000e+00> : vector<1x4xf32>
    %9 = tpu.matmul %5, %8, %cst_7 {dimension_numbers = #tpu.dot_dimension_numbers<[1], [0], [0], [1], [0, 0, 1, 1], [], []>} : vector<1x64xf32>, vector<64x4xf32>, vector<1x4xf32> -> vector<1x4xf32>
    %cst_8 = arith.constant 0.001953125 : f32
    %10 = vector.broadcast %cst_8 : f32 to vector<1x4xf32>
    %11 = arith.mulf %7, %10 : vector<1x4xf32>
    %cst_9 = arith.constant 0.001953125 : f32
    %12 = vector.broadcast %cst_9 : f32 to vector<1x4xf32>
    %13 = arith.mulf %9, %12 : vector<1x4xf32>
    %14 = arith.mulf %11, %11 : vector<1x4xf32>
    %15 = arith.subf %13, %14 : vector<1x4xf32>
    %c0_10 = arith.constant 0 : index
    %c0_11 = arith.constant 0 : index
    %16 = vector.load %arg2[%c0_10, %c0_11] : memref<1x4xf32, #tpu.memory_space<vmem>>, vector<1x4xf32>
    %cst_12 = arith.constant 9.99999974E-6 : f32
    %17 = vector.broadcast %cst_12 : f32 to vector<1x4xf32>
    %18 = arith.addf %15, %17 : vector<1x4xf32>
    %19 = math.rsqrt %18 : vector<1x4xf32>
    %20 = arith.mulf %16, %19 : vector<1x4xf32>
    %c0_13 = arith.constant 0 : index
    %c0_14 = arith.constant 0 : index
    %21 = vector.load %arg3[%c0_13, %c0_14] : memref<1x4xf32, #tpu.memory_space<vmem>>, vector<1x4xf32>
    %22 = arith.mulf %11, %20 : vector<1x4xf32>
    %23 = arith.subf %21, %22 : vector<1x4xf32>
    %c0_15 = arith.constant 0 : index
    %c0_16 = arith.constant 0 : index
    %24 = vector.load %arg5[%c0_15, %c0_16] : memref<4x64xf32, #tpu.memory_space<vmem>>, vector<4x64xf32>
    %cst_17 = arith.constant dense<0.000000e+00> : vector<1x64xf32>
    %25 = tpu.matmul %20, %24, %cst_17 {dimension_numbers = #tpu.dot_dimension_numbers<[1], [0], [0], [1], [0, 0, 1, 1], [], []>} : vector<1x4xf32>, vector<4x64xf32>, vector<1x64xf32> -> vector<1x64xf32>
    %c0_18 = arith.constant 0 : index
    %c0_19 = arith.constant 0 : index
    %26 = vector.load %arg5[%c0_18, %c0_19] : memref<4x64xf32, #tpu.memory_space<vmem>>, vector<4x64xf32>
    %cst_20 = arith.constant dense<0.000000e+00> : vector<1x64xf32>
    %27 = tpu.matmul %23, %26, %cst_20 {dimension_numbers = #tpu.dot_dimension_numbers<[1], [0], [0], [1], [0, 0, 1, 1], [], []>} : vector<1x4xf32>, vector<4x64xf32>, vector<1x64xf32> -> vector<1x64xf32>
    %28 = vector.broadcast %25 : vector<1x64xf32> to vector<32x64xf32>
    %29 = arith.mulf %0, %28 : vector<32x64xf32>
    %30 = vector.broadcast %27 : vector<1x64xf32> to vector<32x64xf32>
    %31 = arith.addf %29, %30 : vector<32x64xf32>
    %cst_21 = arith.constant 0.000000e+00 : f32
    %32 = vector.broadcast %cst_21 : f32 to vector<32x64xf32>
    %33 = arith.maximumf %31, %32 : vector<32x64xf32>
    %c0_22 = arith.constant 0 : index
    %c0_23 = arith.constant 0 : index
    %34 = vector.load %arg7[%c0_22, %c0_23] : memref<64x128xf32, #tpu.memory_space<vmem>>, vector<64x128xf32>
    %cst_24 = arith.constant dense<0.000000e+00> : vector<32x128xf32>
    %35 = tpu.matmul %33, %34, %cst_24 {dimension_numbers = #tpu.dot_dimension_numbers<[1], [0], [0], [1], [0, 0, 1, 1], [], []>} : vector<32x64xf32>, vector<64x128xf32>, vector<32x128xf32> -> vector<32x128xf32>
    %c0_25 = arith.constant 0 : index
    %c0_26 = arith.constant 0 : index
    %36 = vector.load %arg13[%c0_25, %c0_26] : memref<32x32xf32, #tpu.memory_space<vmem>>, vector<32x32xf32>
    %cst_27 = arith.constant dense<0.000000e+00> : vector<32x64xf32>
    %37 = tpu.matmul %36, %33, %cst_27 {dimension_numbers = #tpu.dot_dimension_numbers<[1], [0], [0], [1], [0, 0, 1, 1], [], []>} : vector<32x32xf32>, vector<32x64xf32>, vector<32x64xf32> -> vector<32x64xf32>
    %c0_28 = arith.constant 0 : index
    %c0_29 = arith.constant 0 : index
    %38 = vector.load %arg14[%c0_28, %c0_29] : memref<32x32xf32, #tpu.memory_space<vmem>>, vector<32x32xf32>
    %cst_30 = arith.constant dense<0.000000e+00> : vector<32x64xf32>
    %39 = tpu.matmul %38, %33, %cst_30 {dimension_numbers = #tpu.dot_dimension_numbers<[1], [0], [0], [1], [0, 0, 1, 1], [], []>} : vector<32x32xf32>, vector<32x64xf32>, vector<32x64xf32> -> vector<32x64xf32>
    %c0_31 = arith.constant 0 : index
    %c0_32 = arith.constant 0 : index
    %c0_33 = arith.constant 0 : index
    %40 = vector.load %arg6[%c0_31, %c0_32, %c0_33] : memref<3x64x128xf32, #tpu.memory_space<vmem>>, vector<1x64x128xf32>
    %41 = vector.shape_cast %40 : vector<1x64x128xf32> to vector<64x128xf32>
    %cst_34 = arith.constant dense<0.000000e+00> : vector<32x128xf32>
    %42 = tpu.matmul %37, %41, %cst_34 {dimension_numbers = #tpu.dot_dimension_numbers<[1], [0], [0], [1], [0, 0, 1, 1], [], []>} : vector<32x64xf32>, vector<64x128xf32>, vector<32x128xf32> -> vector<32x128xf32>
    %c1 = arith.constant 1 : index
    %c0_35 = arith.constant 0 : index
    %c0_36 = arith.constant 0 : index
    %43 = vector.load %arg6[%c1, %c0_35, %c0_36] : memref<3x64x128xf32, #tpu.memory_space<vmem>>, vector<1x64x128xf32>
    %44 = vector.shape_cast %43 : vector<1x64x128xf32> to vector<64x128xf32>
    %cst_37 = arith.constant dense<0.000000e+00> : vector<32x128xf32>
    %45 = tpu.matmul %33, %44, %cst_37 {dimension_numbers = #tpu.dot_dimension_numbers<[1], [0], [0], [1], [0, 0, 1, 1], [], []>} : vector<32x64xf32>, vector<64x128xf32>, vector<32x128xf32> -> vector<32x128xf32>
    %46 = arith.addf %42, %45 : vector<32x128xf32>
    %c2 = arith.constant 2 : index
    %c0_38 = arith.constant 0 : index
    %c0_39 = arith.constant 0 : index
    %47 = vector.load %arg6[%c2, %c0_38, %c0_39] : memref<3x64x128xf32, #tpu.memory_space<vmem>>, vector<1x64x128xf32>
    %48 = vector.shape_cast %47 : vector<1x64x128xf32> to vector<64x128xf32>
    %cst_40 = arith.constant dense<0.000000e+00> : vector<32x128xf32>
    %49 = tpu.matmul %39, %48, %cst_40 {dimension_numbers = #tpu.dot_dimension_numbers<[1], [0], [0], [1], [0, 0, 1, 1], [], []>} : vector<32x64xf32>, vector<64x128xf32>, vector<32x128xf32> -> vector<32x128xf32>
    %50 = arith.addf %46, %49 : vector<32x128xf32>
    %cst_41 = arith.constant dense<0.000000e+00> : vector<128xf32>
    %51 = vector.multi_reduction <add>, %50, %cst_41 [0] : vector<32x128xf32> to vector<128xf32>
    %52 = vector.shape_cast %51 : vector<128xf32> to vector<1x128xf32>
    %53 = arith.mulf %50, %50 : vector<32x128xf32>
    %cst_42 = arith.constant dense<0.000000e+00> : vector<128xf32>
    %54 = vector.multi_reduction <add>, %53, %cst_42 [0] : vector<32x128xf32> to vector<128xf32>
    %55 = vector.shape_cast %54 : vector<128xf32> to vector<1x128xf32>
    %c0_43 = arith.constant 0 : index
    %c0_44 = arith.constant 0 : index
    %56 = vector.load %arg10[%c0_43, %c0_44] : memref<128x8xf32, #tpu.memory_space<vmem>>, vector<128x8xf32>
    %cst_45 = arith.constant dense<0.000000e+00> : vector<1x8xf32>
    %57 = tpu.matmul %52, %56, %cst_45 {dimension_numbers = #tpu.dot_dimension_numbers<[1], [0], [0], [1], [0, 0, 1, 1], [], []>} : vector<1x128xf32>, vector<128x8xf32>, vector<1x8xf32> -> vector<1x8xf32>
    %c0_46 = arith.constant 0 : index
    %c0_47 = arith.constant 0 : index
    %58 = vector.load %arg10[%c0_46, %c0_47] : memref<128x8xf32, #tpu.memory_space<vmem>>, vector<128x8xf32>
    %cst_48 = arith.constant dense<0.000000e+00> : vector<1x8xf32>
    %59 = tpu.matmul %55, %58, %cst_48 {dimension_numbers = #tpu.dot_dimension_numbers<[1], [0], [0], [1], [0, 0, 1, 1], [], []>} : vector<1x128xf32>, vector<128x8xf32>, vector<1x8xf32> -> vector<1x8xf32>
    %cst_49 = arith.constant 0.001953125 : f32
    %60 = vector.broadcast %cst_49 : f32 to vector<1x8xf32>
    %61 = arith.mulf %57, %60 : vector<1x8xf32>
    %cst_50 = arith.constant 0.001953125 : f32
    %62 = vector.broadcast %cst_50 : f32 to vector<1x8xf32>
    %63 = arith.mulf %59, %62 : vector<1x8xf32>
    %64 = arith.mulf %61, %61 : vector<1x8xf32>
    %65 = arith.subf %63, %64 : vector<1x8xf32>
    %c0_51 = arith.constant 0 : index
    %c0_52 = arith.constant 0 : index
    %66 = vector.load %arg8[%c0_51, %c0_52] : memref<1x8xf32, #tpu.memory_space<vmem>>, vector<1x8xf32>
    %cst_53 = arith.constant 9.99999974E-6 : f32
    %67 = vector.broadcast %cst_53 : f32 to vector<1x8xf32>
    %68 = arith.addf %65, %67 : vector<1x8xf32>
    %69 = math.rsqrt %68 : vector<1x8xf32>
    %70 = arith.mulf %66, %69 : vector<1x8xf32>
    %c0_54 = arith.constant 0 : index
    %c0_55 = arith.constant 0 : index
    %71 = vector.load %arg9[%c0_54, %c0_55] : memref<1x8xf32, #tpu.memory_space<vmem>>, vector<1x8xf32>
    %72 = arith.mulf %61, %70 : vector<1x8xf32>
    %73 = arith.subf %71, %72 : vector<1x8xf32>
    %c0_56 = arith.constant 0 : index
    %c0_57 = arith.constant 0 : index
    %74 = vector.load %arg11[%c0_56, %c0_57] : memref<8x128xf32, #tpu.memory_space<vmem>>, vector<8x128xf32>
    %cst_58 = arith.constant dense<0.000000e+00> : vector<1x128xf32>
    %75 = tpu.matmul %70, %74, %cst_58 {dimension_numbers = #tpu.dot_dimension_numbers<[1], [0], [0], [1], [0, 0, 1, 1], [], []>} : vector<1x8xf32>, vector<8x128xf32>, vector<1x128xf32> -> vector<1x128xf32>
    %c0_59 = arith.constant 0 : index
    %c0_60 = arith.constant 0 : index
    %76 = vector.load %arg11[%c0_59, %c0_60] : memref<8x128xf32, #tpu.memory_space<vmem>>, vector<8x128xf32>
    %cst_61 = arith.constant dense<0.000000e+00> : vector<1x128xf32>
    %77 = tpu.matmul %73, %76, %cst_61 {dimension_numbers = #tpu.dot_dimension_numbers<[1], [0], [0], [1], [0, 0, 1, 1], [], []>} : vector<1x8xf32>, vector<8x128xf32>, vector<1x128xf32> -> vector<1x128xf32>
    %78 = vector.broadcast %75 : vector<1x128xf32> to vector<32x128xf32>
    %79 = arith.mulf %50, %78 : vector<32x128xf32>
    %80 = vector.broadcast %77 : vector<1x128xf32> to vector<32x128xf32>
    %81 = arith.addf %79, %80 : vector<32x128xf32>
    %cst_62 = arith.constant 0.000000e+00 : f32
    %82 = vector.broadcast %cst_62 : f32 to vector<32x128xf32>
    %83 = arith.maximumf %81, %82 : vector<32x128xf32>
    %c0_63 = arith.constant 0 : index
    %c0_64 = arith.constant 0 : index
    %84 = vector.load %arg13[%c0_63, %c0_64] : memref<32x32xf32, #tpu.memory_space<vmem>>, vector<32x32xf32>
    %cst_65 = arith.constant dense<0.000000e+00> : vector<32x128xf32>
    %85 = tpu.matmul %84, %83, %cst_65 {dimension_numbers = #tpu.dot_dimension_numbers<[1], [0], [0], [1], [0, 0, 1, 1], [], []>} : vector<32x32xf32>, vector<32x128xf32>, vector<32x128xf32> -> vector<32x128xf32>
    %c0_66 = arith.constant 0 : index
    %c0_67 = arith.constant 0 : index
    %86 = vector.load %arg14[%c0_66, %c0_67] : memref<32x32xf32, #tpu.memory_space<vmem>>, vector<32x32xf32>
    %cst_68 = arith.constant dense<0.000000e+00> : vector<32x128xf32>
    %87 = tpu.matmul %86, %83, %cst_68 {dimension_numbers = #tpu.dot_dimension_numbers<[1], [0], [0], [1], [0, 0, 1, 1], [], []>} : vector<32x32xf32>, vector<32x128xf32>, vector<32x128xf32> -> vector<32x128xf32>
    %c0_69 = arith.constant 0 : index
    %c0_70 = arith.constant 0 : index
    %c0_71 = arith.constant 0 : index
    %88 = vector.load %arg12[%c0_69, %c0_70, %c0_71] : memref<3x128x128xf32, #tpu.memory_space<vmem>>, vector<1x128x128xf32>
    %89 = vector.shape_cast %88 : vector<1x128x128xf32> to vector<128x128xf32>
    %cst_72 = arith.constant dense<0.000000e+00> : vector<32x128xf32>
    %90 = tpu.matmul %85, %89, %cst_72 {dimension_numbers = #tpu.dot_dimension_numbers<[1], [0], [0], [1], [0, 0, 1, 1], [], []>} : vector<32x128xf32>, vector<128x128xf32>, vector<32x128xf32> -> vector<32x128xf32>
    %c1_73 = arith.constant 1 : index
    %c0_74 = arith.constant 0 : index
    %c0_75 = arith.constant 0 : index
    %91 = vector.load %arg12[%c1_73, %c0_74, %c0_75] : memref<3x128x128xf32, #tpu.memory_space<vmem>>, vector<1x128x128xf32>
    %92 = vector.shape_cast %91 : vector<1x128x128xf32> to vector<128x128xf32>
    %cst_76 = arith.constant dense<0.000000e+00> : vector<32x128xf32>
    %93 = tpu.matmul %83, %92, %cst_76 {dimension_numbers = #tpu.dot_dimension_numbers<[1], [0], [0], [1], [0, 0, 1, 1], [], []>} : vector<32x128xf32>, vector<128x128xf32>, vector<32x128xf32> -> vector<32x128xf32>
    %94 = arith.addf %90, %93 : vector<32x128xf32>
    %c2_77 = arith.constant 2 : index
    %c0_78 = arith.constant 0 : index
    %c0_79 = arith.constant 0 : index
    %95 = vector.load %arg12[%c2_77, %c0_78, %c0_79] : memref<3x128x128xf32, #tpu.memory_space<vmem>>, vector<1x128x128xf32>
    %96 = vector.shape_cast %95 : vector<1x128x128xf32> to vector<128x128xf32>
    %cst_80 = arith.constant dense<0.000000e+00> : vector<32x128xf32>
    %97 = tpu.matmul %87, %96, %cst_80 {dimension_numbers = #tpu.dot_dimension_numbers<[1], [0], [0], [1], [0, 0, 1, 1], [], []>} : vector<32x128xf32>, vector<128x128xf32>, vector<32x128xf32> -> vector<32x128xf32>
    %98 = arith.addf %94, %97 : vector<32x128xf32>
    %99 = arith.addf %35, %98 : vector<32x128xf32>
    %c0_81 = arith.constant 0 : index
    %c0_82 = arith.constant 0 : index
    %100 = vector.load %arg15[%c0_81, %c0_82] : memref<32x128xf32, #tpu.memory_space<vmem>>, vector<32x128xf32>
    tpu.vector_store %arg15[%c0_81, %c0_82], %99 {strides = array<i32>} : memref<32x128xf32, #tpu.memory_space<vmem>>, vector<32x128xf32>,
    return
  }
  func.func @transform_0(%arg0: i32) -> (i32, i32) {
    %c0_i32 = arith.constant 0 : i32
    %c0_i32_0 = arith.constant 0 : i32
    %c0_i32_1 = arith.constant 0 : i32
    return %c0_i32, %c0_i32_0 : i32, i32
  }
  func.func @transform_1(%arg0: i32) -> (i32, i32) {
    %c0_i32 = arith.constant 0 : i32
    %c0_i32_0 = arith.constant 0 : i32
    %c0_i32_1 = arith.constant 0 : i32
    return %c0_i32, %c0_i32_0 : i32, i32
  }
  func.func @transform_2(%arg0: i32) -> (i32, i32) {
    %c0_i32 = arith.constant 0 : i32
    %c0_i32_0 = arith.constant 0 : i32
    %c0_i32_1 = arith.constant 0 : i32
    return %c0_i32, %c0_i32_0 : i32, i32
  }
  func.func @transform_3(%arg0: i32) -> (i32, i32) {
    %c0_i32 = arith.constant 0 : i32
    %c0_i32_0 = arith.constant 0 : i32
    %c0_i32_1 = arith.constant 0 : i32
    return %c0_i32, %c0_i32_0 : i32, i32
  }
  func.func @transform_4(%arg0: i32) -> (i32, i32) {
    %c0_i32 = arith.constant 0 : i32
    %c0_i32_0 = arith.constant 0 : i32
    %c0_i32_1 = arith.constant 0 : i32
    return %c0_i32, %c0_i32_0 : i32, i32
  }
  func.func @transform_5(%arg0: i32) -> (i32, i32, i32) {
    %c0_i32 = arith.constant 0 : i32
    %c0_i32_0 = arith.constant 0 : i32
    %c0_i32_1 = arith.constant 0 : i32
    %c0_i32_2 = arith.constant 0 : i32
    return %c0_i32, %c0_i32_0, %c0_i32_1 : i32, i32, i32
  }
  func.func @transform_6(%arg0: i32) -> (i32, i32) {
    %c0_i32 = arith.constant 0 : i32
    %c0_i32_0 = arith.constant 0 : i32
    %c0_i32_1 = arith.constant 0 : i32
    return %c0_i32, %c0_i32_0 : i32, i32
  }
  func.func @transform_7(%arg0: i32) -> (i32, i32) {
    %c0_i32 = arith.constant 0 : i32
    %c0_i32_0 = arith.constant 0 : i32
    %c0_i32_1 = arith.constant 0 : i32
    return %c0_i32, %c0_i32_0 : i32, i32
  }
  func.func @transform_8(%arg0: i32) -> (i32, i32) {
    %c0_i32 = arith.constant 0 : i32
    %c0_i32_0 = arith.constant 0 : i32
    %c0_i32_1 = arith.constant 0 : i32
    return %c0_i32, %c0_i32_0 : i32, i32
  }
  func.func @transform_9(%arg0: i32) -> (i32, i32) {
    %c0_i32 = arith.constant 0 : i32
    %c0_i32_0 = arith.constant 0 : i32
    %c0_i32_1 = arith.constant 0 : i32
    return %c0_i32, %c0_i32_0 : i32, i32
  }
  func.func @transform_10(%arg0: i32) -> (i32, i32) {
    %c0_i32 = arith.constant 0 : i32
    %c0_i32_0 = arith.constant 0 : i32
    %c0_i32_1 = arith.constant 0 : i32
    return %c0_i32, %c0_i32_0 : i32, i32
  }
  func.func @transform_11(%arg0: i32) -> (i32, i32, i32) {
    %c0_i32 = arith.constant 0 : i32
    %c0_i32_0 = arith.constant 0 : i32
    %c0_i32_1 = arith.constant 0 : i32
    %c0_i32_2 = arith.constant 0 : i32
    return %c0_i32, %c0_i32_0, %c0_i32_1 : i32, i32, i32
  }
  func.func @transform_12(%arg0: i32) -> (i32, i32) {
    %c0_i32 = arith.constant 0 : i32
    %c0_i32_0 = arith.constant 0 : i32
    %c0_i32_1 = arith.constant 0 : i32
    return %c0_i32, %c0_i32_0 : i32, i32
  }
  func.func @transform_13(%arg0: i32) -> (i32, i32) {
    %c0_i32 = arith.constant 0 : i32
    %c0_i32_0 = arith.constant 0 : i32
    %c0_i32_1 = arith.constant 0 : i32
    return %c0_i32, %c0_i32_0 : i32, i32
  }
  func.func @transform_14(%arg0: i32) -> (i32, i32) {
    %c0_i32 = arith.constant 0 : i32
    %c0_i32_0 = arith.constant 0 : i32
    %c0_i32_1 = arith.constant 0 : i32
    return %c0_i32, %c0_i32_0 : i32, i32
  }
}

</mosaic_0001>

<bundles_post_ra>
// kernel: tpu_custom_call.1
= control target key start
LH: loop header
LB: loop body
LE: loop exit
PB: predicated region body
PF: predicated region fallthrough
CT: control target
= control target key end

     0   :  { %19 = vsyncpa [#allocation3], 0  ;;  %s3711_s0 = inlined_call_operand.hbm [shape: f32[32,64], index: 0, kind: input, shape index: {}]   ;;  %s3712_s1 = inlined_call_operand.vmem [shape: f32[1,4], index: 1, kind: input, shape index: {}]   ;;  %s3713_s2 = inlined_call_operand.vmem [shape: f32[1,4], index: 2, kind: input, shape index: {}]   ;;  %s3714_s3 = inlined_call_operand.vmem [shape: f32[64,4], index: 3, kind: input, shape index: {}]   ;;  %s3715_s4 = inlined_call_operand.hbm [shape: f32[4,64], index: 4, kind: input, shape index: {}]   ;;  %s3716_s5 = inlined_call_operand.vmem [shape: f32[3,64,128], index: 5, kind: input, shape index: {}]   ;;  %s3717_s6 = inlined_call_operand.hbm [shape: f32[64,128], index: 6, kind: input, shape index: {}]   ;;  %s3718_s7 = inlined_call_operand.hbm [shape: f32[1,8], index: 7, kind: input, shape index: {}]   ;;  %s3719_s8 = inlined_call_operand.hbm [shape: f32[1,8], index: 8, kind: input, shape index: {}]   ;;  %s3720_s9 = inlined_call_operand.vmem [shape: f32[128,8], index: 9, kind: input, shape index: {}]   ;;  %s3721_s10 = inlined_call_operand.vmem [shape: f32[8,128], index: 10, kind: input, shape index: {}]   ;;  %s3722_s11 = inlined_call_operand.hbm [shape: f32[3,128,128], index: 11, kind: input, shape index: {}]   ;;  %s3723_s12 = inlined_call_operand.vmem [shape: f32[32,32], index: 12, kind: input, shape index: {}]   ;;  %s3724_s13 = inlined_call_operand.hbm [shape: f32[32,32], index: 13, kind: input, shape index: {}]   ;;  %s3725_s14 = inlined_call_operand.hbm [shape: f32[32,128], index: 14, kind: output, shape index: {}]  }
   0x1   :  { %20 = vsyncpa [#allocation6], 0 }
   0x2   :  { %21 = vsyncpa [#allocation9], 0 }
   0x3   :  { %22 = vsyncpa [#allocation12], 0 }
   0x4   :  { %23 = vsyncpa [#allocation4], 0  ;;  %s3115_s29 = smov [#allocation5]   ;;  %s3116_s15 = smov [#allocation8]  }
   0x5   :  { %s48_s30 = sshll.u32 %s3115_s29, 4  ;;  %s72_s16 = sshll.u32 %s3116_s15, 4  ;;  %s49_s30 = int_to_ptr.vmem [resolvable:$true] %s48_s30  ;;  %s73_s16 = int_to_ptr.vmem [resolvable:$true] %s72_s16 }
   0x6   :  { %s2929_s19 = scalar_lea.hbm %s3715_s4, 64 }
   0x7   :  { %p2930_p0 = scmp.ne.s32.totalorder %s3715_s4, %s2929_s19  ;;  %p2933_p1 = scmp.lt.u32.totalorder %s2929_s19, %s3715_s4 }
   0x9   :  { %p2935_p2 = pnand %p2933_p1, %p2930_p0 }
   0xb   :  { %2938 = shalt.err (!%p2935_p2)
}
   0xc   :  { %s2939_s24 = scalar_lea.vmem %s49_s30, 64  ;;  %p2944_p4 = scmp.lt.s32.totalorder %s49_s30, %s49_s30 }
   0xd   :  { %p2940_p3 = scmp.ne.s32.totalorder %s49_s30, %s2939_s24  ;;  %p2945_p5 = scmp.lt.s32.totalorder %s2939_s24, %s2939_s24 }
   0xf   :  { %p2946_p6 = por %p2945_p5, %p2944_p4 }
  0x11   :  { %p2947_p7 = pnand %p2946_p6, %p2940_p3 }
  0x13   :  { %2950 = shalt.err (!%p2947_p7)
}
  0x14   :  { %51 = dma.hbm_to_vmem [thread:$0]  %s3715_s4, 64, %s49_s30, [#allocation6]  }
  0x15   :  { %s2951_s29 = scalar_lea.hbm %s3718_s7, 16 }
  0x16   :  { %p2952_p8 = scmp.ne.s32.totalorder %s3718_s7, %s2951_s29  ;;  %p2955_p9 = scmp.lt.u32.totalorder %s2951_s29, %s3718_s7 }
  0x18   :  { %p2957_p10 = pnand %p2955_p9, %p2952_p8 }
  0x1a   :  { %2960 = shalt.err (!%p2957_p10)
}
  0x1b   :  { %s2961_s20 = scalar_lea.vmem %s73_s16, 16  ;;  %s2965_s21 = scalar_lea.vmem %s73_s16, 32 }
  0x1c   :  { %p2962_p11 = scmp.ne.s32.totalorder %s73_s16, %s2961_s20  ;;  %p2966_p12 = scmp.lt.s32.totalorder %s73_s16, %s73_s16 }
  0x1d   :  { %p2967_p13 = scmp.lt.s32.totalorder %s2965_s21, %s2961_s20 }
  0x1f   :  { %p2968_p0 = por %p2967_p13, %p2966_p12 }
  0x21   :  { %p2969_p1 = pnand %p2968_p0, %p2962_p11 }
  0x23   :  { %2972 = shalt.err (!%p2969_p1)
}
  0x24   :  { %75 = dma.hbm_to_vmem [thread:$0]  %s3718_s7, 16, %s73_s16, [#allocation9]  }
  0x25   :  { %s3117_s22 = smov [#allocation11]   ;;  %s3118_s24 = smov [#allocation2]  }
  0x26   :  { %s95_s23 = sshll.u32 %s3117_s22, 4  ;;  %s29_s25 = sshll.u32 %s3118_s24, 4  ;;  %s96_s23 = int_to_ptr.vmem [resolvable:$true] %s95_s23  ;;  %s3227_s25 = int_to_ptr.vmem [resolvable:$true] %s29_s25 }
  0x27   :  { %s2973_s28 = scalar_lea.hbm %s3722_s11, 6144 }
  0x28   :  { %p2974_p2 = scmp.ne.s32.totalorder %s3722_s11, %s2973_s28  ;;  %p2977_p3 = scmp.lt.u32.totalorder %s2973_s28, %s3722_s11 }
  0x2a   :  { %p2979_p4 = pnand %p2977_p3, %p2974_p2 }
  0x2c   :  { %2982 = shalt.err (!%p2979_p4)
}
  0x2d   :  { %s2983_s7 = scalar_lea.vmem %s96_s23, 6144  ;;  %p2988_p6 = scmp.lt.s32.totalorder %s96_s23, %s96_s23 }
  0x2e   :  { %p2984_p5 = scmp.ne.s32.totalorder %s96_s23, %s2983_s7  ;;  %p2989_p7 = scmp.lt.s32.totalorder %s2983_s7, %s2983_s7 }
  0x30   :  { %p2990_p8 = por %p2989_p7, %p2988_p6 }
  0x32   :  { %p2991_p9 = pnand %p2990_p8, %p2984_p5 }
  0x34   :  { %2994 = shalt.err (!%p2991_p9)
}
  0x35   :  { %s3119_s16 = smov 128   ;;  %s3120_s19 = smov 8  }
  0x36   :  { %101 = dma.hbm_to_vmem [thread:$0]  %s3722_s11, 6144, %s96_s23, [#allocation12], %s3119_s16, %s3119_s16, %s3120_s19  }
  0x37   :  { %s2995_s22 = scalar_lea.hbm %s3711_s0, 512 }
  0x38   :  { %p2996_p10 = scmp.ne.s32.totalorder %s3711_s0, %s2995_s22  ;;  %p2999_p11 = scmp.lt.u32.totalorder %s2995_s22, %s3711_s0 }
  0x3a   :  { %p3001_p12 = pnand %p2999_p11, %p2996_p10 }
  0x3c   :  { %3004 = shalt.err (!%p3001_p12)
}
  0x3d   :  { %s3005_s29 = scalar_lea.vmem %s3227_s25, 512  ;;  %p3010_p0 = scmp.lt.s32.totalorder %s3227_s25, %s3227_s25 }
  0x3e   :  { %p3006_p13 = scmp.ne.s32.totalorder %s3227_s25, %s3005_s29  ;;  %p3011_p1 = scmp.lt.s32.totalorder %s3005_s29, %s3005_s29 }
  0x40   :  { %p3012_p2 = por %p3011_p1, %p3010_p0 }
  0x42   :  { %p3013_p3 = pnand %p3012_p2, %p3006_p13 }
  0x44   :  { %3016 = shalt.err (!%p3013_p3)
}
  0x45   :  { %35 = dma.hbm_to_vmem [thread:$0]  %s3711_s0, 512, %s3227_s25, [#allocation3], %s3119_s16, %s3119_s16, %s3120_s19  }
  0x46   :  { %s3121_s15 = smov [#allocation7]   ;;  %s3122_s18 = smov [#allocation10]  }
  0x47   :  { %s59_s17 = sshll.u32 %s3121_s15, 4  ;;  %s82_s7 = sshll.u32 %s3122_s18, 4  ;;  %s60_s17 = int_to_ptr.vmem [resolvable:$true] %s59_s17  ;;  %s83_s7 = int_to_ptr.vmem [resolvable:$true] %s82_s7 }
  0x48   :  { %s3017_s4 = scalar_lea.hbm %s3717_s6, 1024 }
  0x49   :  { %p3018_p4 = scmp.ne.s32.totalorder %s3717_s6, %s3017_s4  ;;  %p3021_p5 = scmp.lt.u32.totalorder %s3017_s4, %s3717_s6 }
  0x4b   :  { %p3023_p6 = pnand %p3021_p5, %p3018_p4 }
  0x4d   :  { %3026 = shalt.err (!%p3023_p6)
}
  0x4e   :  { %s3027_s0 = scalar_lea.vmem %s60_s17, 1024  ;;  %p3032_p8 = scmp.lt.s32.totalorder %s60_s17, %s60_s17 }
  0x4f   :  { %p3028_p7 = scmp.ne.s32.totalorder %s60_s17, %s3027_s0  ;;  %p3033_p9 = scmp.lt.s32.totalorder %s3027_s0, %s3027_s0 }
  0x51   :  { %p3034_p10 = por %p3033_p9, %p3032_p8 }
  0x53   :  { %p3035_p11 = pnand %p3034_p10, %p3028_p7 }
  0x55   :  { %3038 = shalt.err (!%p3035_p11)
}
  0x56   :  { %65 = dma.hbm_to_vmem [thread:$0]  %s3717_s6, 1024, %s60_s17, [#allocation6], %s3119_s16, %s3119_s16, %s3120_s19  }
  0x57   :  { %s3039_s11 = scalar_lea.hbm %s3719_s8, 16 }
  0x58   :  { %p3040_p12 = scmp.ne.s32.totalorder %s3719_s8, %s3039_s11  ;;  %p3043_p13 = scmp.lt.u32.totalorder %s3039_s11, %s3719_s8 }
  0x5a   :  { %p3045_p0 = pnand %p3043_p13, %p3040_p12 }
  0x5c   :  { %3048 = shalt.err (!%p3045_p0)
}
  0x5d   :  { %s3049_s21 = scalar_lea.vmem %s83_s7, 16  ;;  %s3053_s4 = scalar_lea.vmem %s83_s7, 32 }
  0x5e   :  { %p3050_p1 = scmp.ne.s32.totalorder %s83_s7, %s3049_s21  ;;  %p3054_p2 = scmp.lt.s32.totalorder %s83_s7, %s83_s7 }
  0x5f   :  { %p3055_p3 = scmp.lt.s32.totalorder %s3053_s4, %s3049_s21 }
  0x61   :  { %p3056_p4 = por %p3055_p3, %p3054_p2 }
  0x63   :  { %p3057_p5 = pnand %p3056_p4, %p3050_p1 }
  0x65   :  { %3060 = shalt.err (!%p3057_p5)
}
  0x66   :  { %85 = dma.hbm_to_vmem [thread:$0]  %s3719_s8, 16, %s83_s7, [#allocation9]  }
  0x67   :  { %s3123_s30 = smov [#allocation13]   ;;  %s3061_s0 = scalar_lea.hbm %s3724_s13, 512 }
  0x68   :  { %s109_s22 = sshll.u32 %s3123_s30, 4  ;;  %p3062_p6 = scmp.ne.s32.totalorder %s3724_s13, %s3061_s0  ;;  %s110_s22 = int_to_ptr.vmem [resolvable:$true] %s109_s22 }
  0x69   :  { %p3065_p7 = scmp.lt.u32.totalorder %s3061_s0, %s3724_s13 }
  0x6b   :  { %p3067_p8 = pnand %p3065_p7, %p3062_p6 }
  0x6d   :  { %3070 = shalt.err (!%p3067_p8)
}
  0x6e   :  { %s3071_s11 = scalar_lea.vmem %s110_s22, 512  ;;  %p3076_p10 = scmp.lt.s32.totalorder %s110_s22, %s110_s22 }
  0x6f   :  { %p3072_p9 = scmp.ne.s32.totalorder %s110_s22, %s3071_s11  ;;  %p3077_p11 = scmp.lt.s32.totalorder %s3071_s11, %s3071_s11 }
  0x71   :  { %p3078_p12 = por %p3077_p11, %p3076_p10 }
  0x73   :  { %p3079_p13 = pnand %p3078_p12, %p3072_p9 }
  0x75   :  { %3082 = shalt.err (!%p3079_p13)
}
  0x76   :  { %115 = dma.hbm_to_vmem [thread:$0]  %s3724_s13, 512, %s110_s22, [#allocation12], %s3119_s16, %s3119_s16, %s3120_s19  }
  0x77   :  { %3105 = dma.done.wait [#allocation3], 512  }
  0x78   :  { %3106 = vsyncadd [#allocation3], 4294966784 }
  0x79   :  { %3107 = dma.done.wait [#allocation6], 1088  }
  0x7a   :  { %3108 = vsyncadd [#allocation6], 4294966208 }
  0x7b   :  { %3109 = dma.done.wait [#allocation9], 32  }
  0x7c   :  { %3110 = vsyncadd [#allocation9], 4294967264 }
  0x7d   :  { %3111 = dma.done.wait [#allocation12], 6656  }
  0x7e   :  { %3112 = vsyncadd [#allocation12], 4294960640  ;;  %v3124_v0 = vmov 0.0|0.0   ;;  %vm3125_vm0 = vmmov 0   ;;  %v3126_v1 = vmov 0.0   ;;  %v172_v2 = vld [vmem:[%s3714_s3] sm:$0xff] }
  0x7f   :  { %2628 = vmatprep.subr.bf16.mxu1 %v3124_v0  ;;  %2258 = vmatprep.mubr.msk.f32.mxu1 %vm3125_vm0, %v3126_v1  ;;  %v173_v3 = vld [vmem:[%s3714_s3 + $0x8] sm:$0xff]  ;;  %v174_v4 = vld [vmem:[%s3714_s3 + $0x10] sm:$0xff]  ;;  %vm141_vm1 = vcmask 523264   ;;  %v175_v6 = vld [vmem:[%s3714_s3 + $0x18] sm:$0xff]  ;;  %vm342_vm2 = vcmask 1043456   ;;  %vm338_vm3 = vcmask 31744  }
  0x80   :  { %2280 = vmatprep.subr.mxu0 %v3126_v1  ;;  %2282 = vmatprep.mubr.msk.f32.mxu0 %vm3125_vm0, %v3126_v1  ;;  %v2629_v5 = vpack.c.bf16 %v173_v3, %v172_v2  ;;  %v3324_v7 = vld [vmem:[#allocation2] sm:$0xff]  ;;  %v2632_v8 = vpack.c.bf16 %v175_v6, %v174_v4  ;;  %v3326_v9 = vld [vmem:[#allocation2 + $0x8] sm:$0xff]  ;;  %v3328_v10 = vld [vmem:[#allocation2 + $0x10] sm:$0xff]  ;;  %vm521_vm4 = vcmask 261120   ;;  %v489_v4 = vlaneseq }
  0x81   :  { %v3330_v11 = vld [vmem:[#allocation2 + $0x18] sm:$0xff]  ;;  %v142_v12 = vsel %vm141_vm1, %v3324_v7, 0.0  ;;  %v155_v13 = vmul.f32 %v3324_v7, %v3324_v7  ;;  %v176_v14 = vld [vmem:[%s3714_s3 + $0x20] sm:$0xff]  ;;  %v177_v15 = vld [vmem:[%s3714_s3 + $0x28] sm:$0xff]  ;;  %v143_v16 = vsel %vm141_vm1, %v3326_v9, 0.0  ;;  %v145_v17 = vsel %vm141_vm1, %v3328_v10, 0.0 }
  0x82   :  { %2630 = vmatpush3.bf16.msra.mxu1 %v2629_v5  ;;  %v156_v18 = vmul.f32 %v3326_v9, %v3326_v9  ;;  %v144_v19 = vadd.f32 %v143_v16, %v142_v12  ;;  %v157_v20 = vmul.f32 %v3328_v10, %v3328_v10  ;;  %v158_v21 = vmul.f32 %v3330_v11, %v3330_v11  ;;  %v178_v29 = vld [vmem:[%s3714_s3 + $0x30] sm:$0xff]  ;;  %v179_v30 = vld [vmem:[%s3714_s3 + $0x38] sm:$0xff]  ;;  %v337_v48 = vld [vmem:[#allocation5] sm:$0xf] }
  0x83   :  { %2631 = vmatprep.subr.bf16.mxu1 %v3124_v0  ;;  %v159_v22 = vsel %vm141_vm1, %v155_v13, 0.0  ;;  %v147_v23 = vsel %vm141_vm1, %v3330_v11, 0.0  ;;  %v2635_v25 = vpack.c.bf16 %v177_v15, %v176_v14  ;;  %v2638_v34 = vpack.c.bf16 %v179_v30, %v178_v29  ;;  %2281 = vmatpush3.msk.msra.mxu0 %vm342_vm2, %v337_v48  ;;  %v330_v58 = vld [vmem:[%s3712_s1] sm:$0x1]  ;;  %v3391_v3 = vld [vmem:[#allocation13] sm:$0xff]  ;;  %v2002_v30 = vld [vmem:[%s3716_s5 + $0x50] sm:$0xff] }
  0x84   :  { %v160_v24 = vsel %vm141_vm1, %v156_v18, 0.0  ;;  %v146_v26 = vadd.f32 %v145_v17, %v144_v19  ;;  %v162_v28 = vsel %vm141_vm1, %v157_v20, 0.0  ;;  %v164_v31 = vsel %vm141_vm1, %v158_v21, 0.0  ;;  %v334_v61 = vld [vmem:[%s3713_s2] sm:$0x1] }
  0x85   :  { %v161_v27 = vadd.f32 %v160_v24, %v159_v22  ;;  %v3387_v2 = vld [vmem:[%s3723_s12] sm:$0xff]  ;;  %vm1231_vm5 = vcmask 64512  }
  0x86   :  { %2633 = vmatpush3.bf16.msra.mxu1 %v2632_v8  ;;  %v148_v32 = vadd.f32 %v147_v23, %v146_v26 }
  0x87   :  { %2634 = vmatprep.subr.bf16.mxu1 %v3124_v0  ;;  %v163_v33 = vadd.f32 %v162_v28, %v161_v27 }
  0x88   :  { %v149_v35 = vrot.slane %v148_v32, 4 }
  0x89   :  { %v165_v36 = vadd.f32 %v164_v31, %v163_v33  ;;  %v2003_v31 = vld [vmem:[%s3716_s5 + $0x58] sm:$0xff]  ;;  %v3432_v33 = vld [vmem:[#allocation13 + $0x8] sm:$0xff] }
  0x8a   :  { %2636 = vmatpush3.bf16.msra.mxu1 %v2635_v25  ;;  %v150_v37 = vadd.f32 %v149_v35, %v148_v32  ;;  %v3430_v32 = vld [vmem:[%s3723_s12 + $0x8] sm:$0xff]  ;;  %v2672_v35 = vpack.c.bf16 %v2003_v31, %v2002_v30  ;;  %v1069_v31 = vld [vmem:[%s3720_s9 + $0x30] sm:$0xff] }
  0x8b   :  { %2637 = vmatprep.subr.bf16.mxu1 %v3124_v0  ;;  %v166_v39 = vrot.slane %v165_v36, 4 }
  0x8c   :  { %v151_v38 = vrot.slane %v150_v37, 2 }
  0x8d   :  { %v167_v42 = vadd.f32 %v166_v39, %v165_v36  ;;  %v2004_v36 = vld [vmem:[%s3716_s5 + $0x60] sm:$0xff]  ;;  %v3457_v39 = vld [vmem:[%s3723_s12 + $0x18] sm:$0xff] }
  0x8e   :  { %2639 = vmatpush3.bf16.msra.mxu1 %v2638_v34  ;;  %v152_v40 = vadd.f32 %v151_v38, %v150_v37  ;;  %v2005_v37 = vld [vmem:[%s3716_s5 + $0x68] sm:$0xff]  ;;  %v3446_v38 = vld [vmem:[#allocation13 + $0x10] sm:$0xff] }
  0x8f   :  { %2640 = vmatprep.subr.bf16.mxu1 %v3124_v0  ;;  %v168_v44 = vrot.slane %v167_v42, 2 }
  0x90   :  { %v153_v41 = vrot.slane %v152_v40, 1 }
  0x91   :  { %v169_v45 = vadd.f32 %v168_v44, %v167_v42  ;;  %v2006_v42 = vld [vmem:[%s3716_s5 + $0x70] sm:$0xff] }
  0x92   :  { %v154_v43 = vadd.f32 %v153_v41, %v152_v40  ;;  %v3459_v40 = vld [vmem:[#allocation13 + $0x18] sm:$0xff]  ;;  %v2676_v41 = vpack.c.bf16 %v2005_v37, %v2004_v36 }
  0x93   :  { %v170_v46 = vrot.slane %v169_v45, 1  ;;  %v1071_v37 = vld [vmem:[%s3720_s9 + $0x40] sm:$0xff] }
  0x94   :  { %2259 = vmatmul.mubr.msk.f32.vlgmr.msra.gmra.mrb[0].mxu1 %vm141_vm1, %v154_v43  ;;  %v2007_v43 = vld [vmem:[%s3716_s5 + $0x78] sm:$0xff] }
  0x95   :  { %2642 = vmatpush3.bf16.msra.mxu1 %v2629_v5  ;;  %2277 = vmatprep.mubr.msk.f32.mxu1 %vm3125_vm0, %v3126_v1  ;;  %v171_v47 = vadd.f32 %v170_v46, %v169_v45  ;;  %v490_v5 = vshrl.u32 %v489_v4, 7  ;;  %v2680_v44 = vpack.c.bf16 %v2007_v43, %v2006_v42  ;;  %v720_v45 = vld [vmem:[%s3716_s5] sm:$0xff]  ;;  %v721_v46 = vld [vmem:[%s3716_s5 + $0x8] sm:$0xff]  ;;  %v1066_v4 = vld [vmem:[%s3720_s9 + $0x18] sm:$0xff] }
  0x96   :  { %2643 = vmatprep.subr.bf16.mxu1 %v3124_v0  ;;  %v1073_v43 = vld [vmem:[%s3720_s9 + $0x50] sm:$0xff] }
  0x97   :  { %v3395_v6 = vsub.s32 0, %v490_v5 }
  0x99   :  { %2645 = vmatpush3.bf16.msra.mxu1 %v2632_v8 }
  0x9a   :  { %2646 = vmatprep.subr.bf16.mxu1 %v3124_v0 }
  0x9d   :  { %2648 = vmatpush3.bf16.msra.mxu1 %v2635_v25 }
  0x9e   :  { %2649 = vmatprep.subr.bf16.mxu1 %v3124_v0 }
  0xa1   :  { %2651 = vmatpush3.bf16.msra.mxu1 %v2638_v34  ;;  %v3437_v34 = vld [vmem:[%s3723_s12 + $0x10] sm:$0xff] }
  0xa2   :  { %2285 = vmatprep.subr.mxu1 %v3126_v1 }
  0xa4   :  { %2278 = vmatmul.mubr.msk.f32.vlgmr.msra.gmra.mrb[2].mxu1 %vm141_vm1, %v171_v47  ;;  %v2684_v47 = vpack.c.bf16 %v721_v46, %v720_v45  ;;  %v1075_v46 = vld [vmem:[%s3720_s9 + $0x60] sm:$0xff] }
  0xa5   :  { %2287 = vmatprep.mubr.msk.f32.mxu1 %vm3125_vm0, %v3126_v1  ;;  %2286 = vmatpush3.msk.msra.mxu1 %vm342_vm2, %v337_v48  ;;  %v722_v48 = vld [vmem:[%s3716_s5 + $0x10] sm:$0xff] }
 0x167   :  { %v249_v49 = vpop.f32.mrb[0].mxu1 }
 0x168   :  { %v2260_v50 = vpop.f32.mrb[1].mxu1  ;;  %v326_v51 = vmul.f32 0.001953125, %v249_v49  ;;  %v723_v49 = vld [vmem:[%s3716_s5 + $0x18] sm:$0xff] }
 0x169   :  { %v2688_v50 = vpack.c.bf16 %v723_v49, %v722_v48  ;;  %v1077_v49 = vld [vmem:[%s3720_s9 + $0x70] sm:$0xff] }
 0x16a   :  { %v328_v53 = vmul.f32 %v326_v51, %v326_v51 }
 0x177   :  { %v322_v52 = vpop.f32.mrb[2].mxu1 }
 0x178   :  { %v327_v54 = vmul.f32 0.001953125, %v322_v52  ;;  %v2279_v55 = vpop.f32.mrb[3].mxu1  ;;  %v725_v52 = vld [vmem:[%s3716_s5 + $0x28] sm:$0xff] }
 0x179   :  { %v727_v55 = vld [vmem:[%s3716_s5 + $0x38] sm:$0xff] }
 0x17a   :  { %v329_v56 = vsub.f32 %v327_v54, %v328_v53  ;;  %v726_v54 = vld [vmem:[%s3716_s5 + $0x30] sm:$0xff] }
 0x17c   :  { %v331_v57 = vadd.f32 1e-05, %v329_v56  ;;  %v2696_v56 = vpack.c.bf16 %v727_v55, %v726_v54 }
 0x17e   :  { %2925 = vrsqrt.f32 %v331_v57  ;;  %v2016_v57 = vld [vmem:[%s3716_s5 + $0x80] sm:$0xff] }
 0x188   :  { %v2926_v59 = vpop.eup %2925 }
 0x189   :  { %v333_v60 = vmul.f32 %v2926_v59, %v330_v58  ;;  %v2017_v58 = vld [vmem:[%s3716_s5 + $0x88] sm:$0xff] }
 0x18a   :  { %v2700_v59 = vpack.c.bf16 %v2017_v58, %v2016_v57 }
 0x18b   :  { %v335_v62 = vmul.f32 %v333_v60, %v326_v51  ;;  %2283 = vmatmul.mubr.msk.f32.vlgmr.msra.gmra.mrb[0].mxu0 %vm338_vm3, %v333_v60  ;;  %v724_v51 = vld [vmem:[%s3716_s5 + $0x20] sm:$0xff] }
 0x18c   :  { %2298 = vmatprep.mubr.msk.f32.mxu0 %vm521_vm4, %v3387_v2  ;;  %v2692_v53 = vpack.c.bf16 %v725_v52, %v724_v51  ;;  %v1063_v60 = vld [vmem:[%s3720_s9] sm:$0xff] }
 0x18d   :  { %v336_v63 = vsub.f32 %v334_v61, %v335_v62  ;;  %v1064_v61 = vld [vmem:[%s3720_s9 + $0x8] sm:$0xff]  ;;  %v1065_v62 = vld [vmem:[%s3720_s9 + $0x10] sm:$0xff] }
 0x18e   :  { %v3528_v5 = vpack.c.bf16 %v1066_v4, %v1065_v62 }
 0x18f   :  { %2288 = vmatmul.mubr.msk.f32.vlgmr.msra.gmra.mrb[4].mxu1 %vm338_vm3, %v336_v63  ;;  %v3522_v63 = vpack.c.bf16 %v1064_v61, %v1063_v60 }
 0x190   :  { %2312 = vmatprep.mubr.msk.f32.mxu1 %vm521_vm4, %v3391_v3 }
 0x25e   :  { %v412_v8 = vpop.f32.mrb[0].mxu0 }
 0x25f   :  { %v492_v12 = vrot.slane %v412_v8, %v3395_v6  ;;  %v2284_v13 = vpop.f32.mrb[1].mxu0  ;;  %v1067_v8 = vld [vmem:[%s3720_s9 + $0x20] sm:$0xff] }
 0x261   :  { %v493_v14 = vmul.f32 %v492_v12, %v3324_v7  ;;  %v494_v16 = vmul.f32 %v492_v12, %v3326_v9  ;;  %v495_v17 = vmul.f32 %v492_v12, %v3328_v10  ;;  %v496_v18 = vmul.f32 %v492_v12, %v3330_v11  ;;  %v2000_v10 = vld [vmem:[%s3716_s5 + $0x40] sm:$0xff]  ;;  %v2001_v11 = vld [vmem:[%s3716_s5 + $0x48] sm:$0xff] }
 0x262   :  { %v485_v15 = vpop.f32.mrb[4].mxu1  ;;  %v2668_v29 = vpack.c.bf16 %v2001_v11, %v2000_v10  ;;  %v1068_v12 = vld [vmem:[%s3720_s9 + $0x28] sm:$0xff] }
 0x263   :  { %v500_v19 = vrot.slane %v485_v15, %v3395_v6  ;;  %v2289_v20 = vpop.f32.mrb[5].mxu1  ;;  %v3538_v13 = vpack.c.bf16 %v1068_v12, %v1067_v8  ;;  %v2019_v15 = vld [vmem:[%s3716_s5 + $0x98] sm:$0xff] }
 0x265   :  { %v501_v21 = vadd.f32 %v500_v19, %v493_v14  ;;  %v502_v22 = vadd.f32 %v500_v19, %v494_v16  ;;  %v503_v23 = vadd.f32 %v500_v19, %v495_v17  ;;  %v504_v24 = vadd.f32 %v500_v19, %v496_v18  ;;  %v2018_v14 = vld [vmem:[%s3716_s5 + $0x90] sm:$0xff] }
 0x266   :  { %v2704_v19 = vpack.c.bf16 %v2019_v15, %v2018_v14 }
 0x267   :  { %v3403_v25 = vmax.f32 %v501_v21, 0.0  ;;  %v3405_v26 = vmax.f32 %v502_v22, 0.0  ;;  %v3407_v27 = vmax.f32 %v503_v23, 0.0  ;;  %v3409_v7 = vmax.f32 %v504_v24, 0.0  ;;  %v2020_v21 = vld [vmem:[%s3716_s5 + $0xa0] sm:$0xff]  ;;  %v2021_v22 = vld [vmem:[%s3716_s5 + $0xa8] sm:$0xff] }
 0x268   :  { %v2708_v10 = vpack.c.bf16 %v2021_v22, %v2020_v21 }
 0x269   :  { %v2652_v9 = vpack.c.bf16 %v3405_v26, %v3403_v25  ;;  %v2656_v28 = vpack.c.bf16 %v3409_v7, %v3407_v27 }
 0x26b   :  { %2653 = vmatprep.subr.bf16.mxu0 %v2652_v9  ;;  %2661 = vmatprep.subr.bf16.mxu1 %v2652_v9 }
 0x26c   :  { %2655 = vmatpush3.bf16.msra.mxu0 %v2652_v9  ;;  %2663 = vmatpush3.bf16.msra.mxu1 %v2652_v9 }
 0x26d   :  { %2657 = vmatprep.subr.bf16.mxu0 %v2656_v28  ;;  %2665 = vmatprep.subr.bf16.mxu1 %v2656_v28 }
 0x270   :  { %2659 = vmatpush3.bf16.msra.mxu0 %v2656_v28  ;;  %2667 = vmatpush3.bf16.msra.mxu1 %v2656_v28  ;;  %v2022_v28 = vld [vmem:[%s3716_s5 + $0xb0] sm:$0xff] }
 0x271   :  { %2669 = vmatprep.subr.bf16.mxu0 %v2668_v29  ;;  %2716 = vmatprep.subr.bf16.mxu1 %v3124_v0 }
 0x273   :  { %2299 = vmatmul.mubr.msk.f32.vlgmr.msra.gmra.mrb[2].mxu0 %vm521_vm4, %v3430_v32  ;;  %2313 = vmatmul.mubr.msk.f32.vlgmr.msra.gmra.mrb[6].mxu1 %vm521_vm4, %v3432_v33 }
 0x274   :  { %2671 = vmatpush3.bf16.msra.mxu0 %v2668_v29  ;;  %2301 = vmatprep.mubr.msk.f32.mxu0 %vm521_vm4, %v3437_v34  ;;  %v2023_v29 = vld [vmem:[%s3716_s5 + $0xb8] sm:$0xff] }
 0x275   :  { %2673 = vmatprep.subr.bf16.mxu0 %v2672_v35  ;;  %2315 = vmatprep.mubr.msk.f32.mxu1 %vm521_vm4, %v3446_v38  ;;  %v2712_v30 = vpack.c.bf16 %v2023_v29, %v2022_v28 }
 0x276   :  { %2718 = vmatpush3.bf16.msra.mxu1 %v3522_v63 }
 0x277   :  { %2302 = vmatmul.mubr.msk.f32.gmra.mrb[4].mxu0 %vm521_vm4, %v3457_v39  ;;  %2316 = vmatmul.mubr.msk.f32.gmra.mrb[8].mxu1 %vm521_vm4, %v3459_v40 }
 0x278   :  { %2675 = vmatpush3.bf16.msra.mxu0 %v2672_v35  ;;  %2334 = vmatprep.mubr.msk.f32.mxu0 %vm141_vm1, %v3403_v25  ;;  %v1070_v35 = vld [vmem:[%s3720_s9 + $0x38] sm:$0xff] }
 0x279   :  { %2677 = vmatprep.subr.bf16.mxu0 %v2676_v41  ;;  %2416 = vmatprep.mubr.msk.f32.mxu1 %vm3125_vm0, %v3126_v1  ;;  %v2726_v36 = vpack.c.bf16 %v1070_v35, %v1069_v31  ;;  %v1223_v35 = vld [vmem:[#allocation8] sm:$0x1] }
 0x27a   :  { %2719 = vmatprep.subr.bf16.mxu1 %v3124_v0 }
 0x27b   :  { %2721 = vmatpush3.bf16.msra.mxu1 %v3528_v5 }
 0x27c   :  { %2679 = vmatpush3.bf16.msra.mxu0 %v2676_v41  ;;  %2722 = vmatprep.subr.bf16.mxu1 %v3124_v0  ;;  %v1072_v41 = vld [vmem:[%s3720_s9 + $0x48] sm:$0xff] }
 0x27d   :  { %2681 = vmatprep.subr.bf16.mxu0 %v2680_v44  ;;  %v2729_v42 = vpack.c.bf16 %v1072_v41, %v1071_v37  ;;  %v1227_v37 = vld [vmem:[#allocation10] sm:$0x1] }
 0x27f   :  { %2724 = vmatpush3.bf16.msra.mxu1 %v3538_v13 }
 0x280   :  { %2683 = vmatpush3.bf16.msra.mxu0 %v2680_v44  ;;  %2725 = vmatprep.subr.bf16.mxu1 %v3124_v0  ;;  %v1074_v44 = vld [vmem:[%s3720_s9 + $0x58] sm:$0xff] }
 0x281   :  { %2685 = vmatprep.subr.bf16.mxu0 %v2684_v47  ;;  %v2732_v45 = vpack.c.bf16 %v1074_v44, %v1073_v43 }
 0x283   :  { %2335 = vmatmul.mubr.msk.f32.vlgmr.msra.gmra.mrb[6].mxu0 %vm141_vm1, %v3405_v26  ;;  %2727 = vmatpush3.bf16.msra.mxu1 %v2726_v36 }
 0x284   :  { %2337 = vmatprep.mubr.msk.f32.mxu0 %vm141_vm1, %v3407_v27  ;;  %2687 = vmatpush3.bf16.msra.mxu0 %v2684_v47  ;;  %v1076_v47 = vld [vmem:[%s3720_s9 + $0x68] sm:$0xff] }
 0x285   :  { %2689 = vmatprep.subr.bf16.mxu0 %v2688_v50  ;;  %2728 = vmatprep.subr.bf16.mxu1 %v3124_v0  ;;  %v2735_v48 = vpack.c.bf16 %v1076_v47, %v1075_v46 }
 0x287   :  { %2338 = vmatmul.mubr.msk.f32.gmra.mrb[8].mxu0 %vm141_vm1, %v3409_v7  ;;  %2730 = vmatpush3.bf16.msra.mxu1 %v2729_v42 }
 0x288   :  { %2691 = vmatpush3.bf16.msra.mxu0 %v2688_v50  ;;  %2731 = vmatprep.subr.bf16.mxu1 %v3124_v0  ;;  %v1078_v50 = vld [vmem:[%s3720_s9 + $0x78] sm:$0xff] }
 0x289   :  { %2693 = vmatprep.subr.bf16.mxu0 %v2692_v53  ;;  %v2738_v51 = vpack.c.bf16 %v1078_v50, %v1077_v49 }
 0x28b   :  { %2733 = vmatpush3.bf16.msra.mxu1 %v2732_v45 }
 0x28c   :  { %2695 = vmatpush3.bf16.msra.mxu0 %v2692_v53  ;;  %2734 = vmatprep.subr.bf16.mxu1 %v3124_v0 }
 0x28d   :  { %2697 = vmatprep.subr.bf16.mxu0 %v2696_v56 }
 0x28f   :  { %2736 = vmatpush3.bf16.msra.mxu1 %v2735_v48 }
 0x290   :  { %2699 = vmatpush3.bf16.msra.mxu0 %v2696_v56  ;;  %2737 = vmatprep.subr.bf16.mxu1 %v3124_v0 }
 0x291   :  { %2701 = vmatprep.subr.bf16.mxu0 %v2700_v59 }
 0x293   :  { %2739 = vmatpush3.bf16.msra.mxu1 %v2738_v51 }
 0x294   :  { %2740 = vmatprep.subr.bf16.mxu1 %v3124_v0 }
 0x346   :  { %v2300_v16 = vpop.f32.mrb[2].mxu0  ;;  %v2314_v17 = vpop.f32.mrb[6].mxu1 }
 0x347   :  { %v600_v18 = vpop.f32.mrb[3].mxu0  ;;  %v701_v20 = vpop.f32.mrb[7].mxu1 }
 0x348   :  { %2356 = vmatprep.mubr.msk.f32.mxu0 %vm141_vm1, %v600_v18 }
 0x349   :  { %2357 = vmatmul.mubr.msk.f32.vlgmr.msra.gmra.mrb[6].mxu0 %vm141_vm1, %v2300_v16 }
 0x34a   :  { %2703 = vmatpush3.bf16.msra.mxu0 %v2700_v59  ;;  %v2303_v23 = vpop.f32.mrb[4].mxu0  ;;  %v2317_v24 = vpop.f32.mrb[8].mxu1 }
 0x34b   :  { %2705 = vmatprep.subr.bf16.mxu0 %v2704_v19  ;;  %v610_v9 = vpop.f32.mrb[5].mxu0  ;;  %v711_v11 = vpop.f32.mrb[9].mxu1 }
 0x34c   :  { %2359 = vmatprep.mubr.msk.f32.mxu0 %vm141_vm1, %v610_v9 }
 0x34d   :  { %2360 = vmatmul.mubr.msk.f32.gmra.mrb[8].mxu0 %vm141_vm1, %v2303_v23  ;;  %v1230_v23 = vld [vmem:[%s3721_s10] sm:$0xff]  ;;  %s3127_s10 = smov [#allocation14]  }
 0x34e   :  { %2707 = vmatpush3.bf16.msra.mxu0 %v2704_v19  ;;  %2378 = vmatprep.mubr.msk.f32.mxu0 %vm141_vm1, %v701_v20  ;;  %s1971_s30 = sshll.u32 %s3127_s10, 4  ;;  %s1972_s30 = int_to_ptr.vmem [resolvable:$true] %s1971_s30 }
 0x34f   :  { %2709 = vmatprep.subr.bf16.mxu0 %v2708_v10  ;;  %s3083_s22 = scalar_lea.vmem %s1972_s30, 512  ;;  %p3088_p1 = scmp.lt.s32.totalorder %s1972_s30, %s1972_s30 }
 0x350   :  { %p3084_p0 = scmp.ne.s32.totalorder %s1972_s30, %s3083_s22  ;;  %p3089_p2 = scmp.lt.s32.totalorder %s3083_s22, %s3083_s22 }
 0x352   :  { %2711 = vmatpush3.bf16.msra.mxu0 %v2708_v10  ;;  %p3090_p3 = por %p3089_p2, %p3088_p1 }
 0x353   :  { %2713 = vmatprep.subr.bf16.mxu0 %v2712_v30 }
 0x354   :  { %p3091_p4 = pnand %p3090_p3, %p3084_p0 }
 0x356   :  { %2715 = vmatpush3.bf16.msra.mxu0 %v2712_v30 }
 0x357   :  { %2459 = vmatprep.subr.mxu0 %v3126_v1 }
 0x359   :  { %2379 = vmatmul.mubr.msk.f32.vlgmr.msra.gmra.mrb[6].mxu0 %vm141_vm1, %v2314_v17 }
 0x35a   :  { %2381 = vmatprep.mubr.msk.f32.mxu0 %vm141_vm1, %v711_v11  ;;  %2460 = vmatpush3.msra.mxu0 %v1230_v23 }
 0x35d   :  { %2382 = vmatmul.mubr.msk.f32.gmra.mrb[8].mxu0 %vm141_vm1, %v2317_v24 }
 0x35e   :  { %2461 = vmatprep.mubr.msk.f32.mxu0 %vm3125_vm0, %v3126_v1 }
 0x42c   :  { %v3607_v52 = vpop.f32.mrb[6].mxu0 }
 0x42d   :  { %v1051_v53 = vmul.f32 %v3607_v52, %v3607_v52  ;;  %v3611_v54 = vpop.f32.mrb[7].mxu0 }
 0x42e   :  { %v1041_v55 = vadd.f32 %v3607_v52, %v3611_v54  ;;  %v1050_v56 = vmul.f32 %v3611_v54, %v3611_v54 }
 0x430   :  { %v1054_v57 = vadd.f32 %v1051_v53, %v1050_v56  ;;  %v3617_v58 = vpop.f32.mrb[8].mxu0 }
 0x431   :  { %v3619_v59 = vpop.f32.mrb[9].mxu0  ;;  %v1053_v62 = vmul.f32 %v3617_v58, %v3617_v58 }
 0x432   :  { %v1042_v60 = vadd.f32 %v1041_v55, %v3619_v59  ;;  %v1052_v61 = vmul.f32 %v3619_v59, %v3619_v59 }
 0x434   :  { %v1043_v4 = vadd.f32 %v3617_v58, %v1042_v60  ;;  %v1055_v8 = vadd.f32 %v1054_v57, %v1052_v61  ;;  %v1585_v60 = vld [vmem:[#allocation11 + $0x80] sm:$0xff]  ;;  %v1586_v61 = vld [vmem:[#allocation11 + $0x88] sm:$0xff] }
 0x436   :  { %v1044_v12 = vrot.slane %v1043_v4, 4  ;;  %v1056_v14 = vadd.f32 %v1055_v8, %v1053_v62  ;;  %v1568_v62 = vld [vmem:[#allocation11] sm:$0xff]  ;;  %v2780_v8 = vpack.c.bf16 %v1586_v61, %v1585_v60 }
 0x438   :  { %v1045_v15 = vadd.f32 %v1044_v12, %v1043_v4  ;;  %v1057_v20 = vrot.slane %v1056_v14, 4  ;;  %v1569_v4 = vld [vmem:[#allocation11 + $0x8] sm:$0xff] }
 0x439   :  { %v2812_v12 = vpack.c.bf16 %v1569_v4, %v1568_v62 }
 0x43a   :  { %v1046_v16 = vrot.slane %v1045_v15, 2  ;;  %v1058_v21 = vadd.f32 %v1057_v20, %v1056_v14  ;;  %v1587_v14 = vld [vmem:[#allocation11 + $0x90] sm:$0xff]  ;;  %v1571_v20 = vld [vmem:[#allocation11 + $0x18] sm:$0xff] }
 0x43c   :  { %v1047_v17 = vadd.f32 %v1046_v16, %v1045_v15  ;;  %v1588_v15 = vld [vmem:[#allocation11 + $0x98] sm:$0xff] }
 0x43d   :  { %v2784_v16 = vpack.c.bf16 %v1588_v15, %v1587_v14  ;;  %v1779_v14 = vld [vmem:[#allocation11 + $0x138] sm:$0xff] }
 0x43e   :  { %v1048_v18 = vrot.slane %v1047_v17, 1 }
 0x440   :  { %v1049_v19 = vadd.f32 %v1048_v18, %v1047_v17  ;;  %v1589_v17 = vld [vmem:[#allocation11 + $0xa0] sm:$0xff]  ;;  %v1590_v18 = vld [vmem:[#allocation11 + $0xa8] sm:$0xff] }
 0x442   :  { %2417 = vmatmul.mubr.f32.vlgmr.msra.gmra.mrb[10].mxu1 %v1049_v19  ;;  %v1570_v19 = vld [vmem:[#allocation11 + $0x10] sm:$0xff] }
 0x443   :  { %2742 = vmatpush3.bf16.msra.mxu1 %v3522_v63  ;;  %2451 = vmatprep.mubr.msk.f32.mxu1 %vm3125_vm0, %v3126_v1  ;;  %v1059_v63 = vrot.slane %v1058_v21, 2 }
 0x444   :  { %2743 = vmatprep.subr.bf16.mxu1 %v3124_v0 }
 0x445   :  { %v1060_v22 = vadd.f32 %v1059_v63, %v1058_v21  ;;  %v1572_v21 = vld [vmem:[#allocation11 + $0x20] sm:$0xff]  ;;  %v1573_v63 = vld [vmem:[#allocation11 + $0x28] sm:$0xff] }
 0x447   :  { %2745 = vmatpush3.bf16.msra.mxu1 %v3528_v5  ;;  %v1061_v5 = vrot.slane %v1060_v22, 1 }
 0x448   :  { %2746 = vmatprep.subr.bf16.mxu1 %v3124_v0 }
 0x44b   :  { %2748 = vmatpush3.bf16.msra.mxu1 %v3538_v13  ;;  %v1062_v13 = vadd.f32 %v1061_v5, %v1060_v22  ;;  %v2788_v22 = vpack.c.bf16 %v1590_v18, %v1589_v17  ;;  %v2816_v5 = vpack.c.bf16 %v1571_v20, %v1570_v19  ;;  %v1781_v17 = vld [vmem:[#allocation11 + $0x148] sm:$0xff]  ;;  %v1782_v19 = vld [vmem:[#allocation11 + $0x150] sm:$0xff]  ;;  %v1783_v20 = vld [vmem:[#allocation11 + $0x158] sm:$0xff] }
 0x44c   :  { %2749 = vmatprep.subr.bf16.mxu1 %v3124_v0 }
 0x44f   :  { %2751 = vmatpush3.bf16.msra.mxu1 %v2726_v36 }
 0x450   :  { %2752 = vmatprep.subr.bf16.mxu1 %v3124_v0 }
 0x453   :  { %2754 = vmatpush3.bf16.msra.mxu1 %v2729_v42 }
 0x454   :  { %2755 = vmatprep.subr.bf16.mxu1 %v3124_v0 }
 0x457   :  { %2757 = vmatpush3.bf16.msra.mxu1 %v2732_v45 }
 0x458   :  { %2758 = vmatprep.subr.bf16.mxu1 %v3124_v0 }
 0x45b   :  { %2760 = vmatpush3.bf16.msra.mxu1 %v2735_v48 }
 0x45c   :  { %2761 = vmatprep.subr.bf16.mxu1 %v3124_v0 }
 0x45f   :  { %2763 = vmatpush3.bf16.msra.mxu1 %v2738_v51 }
 0x460   :  { %2454 = vmatprep.subr.mxu1 %v3126_v1 }
 0x462   :  { %2452 = vmatmul.mubr.f32.vlgmr.msra.gmra.mrb[12].mxu1 %v1062_v13  ;;  %v1591_v13 = vld [vmem:[#allocation11 + $0xb0] sm:$0xff] }
 0x463   :  { %2456 = vmatprep.mubr.msk.f32.mxu1 %vm3125_vm0, %v3126_v1  ;;  %2455 = vmatpush3.msra.mxu1 %v1230_v23  ;;  %v1592_v23 = vld [vmem:[#allocation11 + $0xb8] sm:$0xff] }
 0x515   :  { %v1145_v24 = vpop.f32.mrb[10].mxu1 }
 0x516   :  { %v2418_v9 = vpop.f32.mrb[11].mxu1  ;;  %v1219_v10 = vmul.f32 0.001953125, %v1145_v24  ;;  %v2792_v24 = vpack.c.bf16 %v1592_v23, %v1591_v13  ;;  %v1786_v13 = vld [vmem:[#allocation11 + $0x170] sm:$0xff]  ;;  %v1787_v23 = vld [vmem:[#allocation11 + $0x178] sm:$0xff] }
 0x517   :  { %v1593_v9 = vld [vmem:[#allocation11 + $0xc0] sm:$0xff] }
 0x518   :  { %v1221_v0 = vmul.f32 %v1219_v10, %v1219_v10 }
 0x535   :  { %v1215_v11 = vpop.f32.mrb[12].mxu1 }
 0x536   :  { %v1220_v28 = vmul.f32 0.001953125, %v1215_v11  ;;  %v2453_v29 = vpop.f32.mrb[13].mxu1  ;;  %v1576_v11 = vld [vmem:[#allocation11 + $0x40] sm:$0xff] }
 0x538   :  { %v1222_v30 = vsub.f32 %v1220_v28, %v1221_v0  ;;  %v1577_v0 = vld [vmem:[#allocation11 + $0x48] sm:$0xff]  ;;  %v1595_v28 = vld [vmem:[#allocation11 + $0xd0] sm:$0xff] }
 0x539   :  { %v2828_v29 = vpack.c.bf16 %v1577_v0, %v1576_v11 }
 0x53a   :  { %v1224_v31 = vadd.f32 1e-05, %v1222_v30  ;;  %v1578_v30 = vld [vmem:[#allocation11 + $0x50] sm:$0xff] }
 0x53c   :  { %2927 = vrsqrt.f32 %v1224_v31  ;;  %v1579_v31 = vld [vmem:[#allocation11 + $0x58] sm:$0xff] }
 0x546   :  { %v2928_v36 = vpop.eup %2927 }
 0x547   :  { %v1226_v1 = vmul.f32 %v2928_v36, %v1223_v35  ;;  %v1597_v36 = vld [vmem:[#allocation11 + $0xe0] sm:$0xff] }
 0x549   :  { %v1228_v41 = vmul.f32 %v1226_v1, %v1219_v10  ;;  %2457 = vmatmul.mubr.msk.f32.vlgmr.msra.gmra.mrb[14].mxu1 %vm1231_vm5, %v1226_v1  ;;  %v1598_v1 = vld [vmem:[#allocation11 + $0xe8] sm:$0xff] }
 0x54a   :  { %2486 = vmatprep.mubr.msk.f32.mxu1 %vm521_vm4, %v3391_v3 }
 0x54b   :  { %v1229_v42 = vsub.f32 %v1227_v37, %v1228_v41  ;;  %v2832_v37 = vpack.c.bf16 %v1579_v31, %v1578_v30  ;;  %v1580_v41 = vld [vmem:[#allocation11 + $0x60] sm:$0xff]  ;;  %v515_v31 = vld [vmem:[#allocation7 + $0x30] sm:$0xff] }
 0x54d   :  { %2462 = vmatmul.mubr.msk.f32.vlgmr.msra.gmra.mrb[10].mxu0 %vm1231_vm5, %v1229_v42  ;;  %v1581_v42 = vld [vmem:[#allocation11 + $0x68] sm:$0xff] }
 0x54e   :  { %2472 = vmatprep.mubr.msk.f32.mxu0 %vm521_vm4, %v3387_v2 }
 0x61c   :  { %v1301_v43 = vpop.f32.mrb[14].mxu1 }
 0x61d   :  { %v1381_v44 = vrot.slane %v1301_v43, %v3395_v6  ;;  %v2458_v45 = vpop.f32.mrb[15].mxu1  ;;  %v2804_v43 = vpack.c.bf16 %v1598_v1, %v1597_v36 }
 0x61e   :  { %v1600_v45 = vld [vmem:[#allocation11 + $0xf8] sm:$0xff] }
 0x61f   :  { %v1382_v46 = vmul.f32 %v1381_v44, %v3611_v54  ;;  %v1383_v47 = vmul.f32 %v3607_v52, %v1381_v44  ;;  %v1384_v48 = vmul.f32 %v1381_v44, %v3619_v59  ;;  %v1385_v49 = vmul.f32 %v3617_v58, %v1381_v44  ;;  %v1599_v44 = vld [vmem:[#allocation11 + $0xf0] sm:$0xff] }
 0x620   :  { %v1374_v50 = vpop.f32.mrb[10].mxu0 }
 0x621   :  { %v1389_v3 = vrot.slane %v1374_v50, %v3395_v6  ;;  %v2463_v51 = vpop.f32.mrb[11].mxu0 }
 0x622   :  { %v1773_v51 = vld [vmem:[#allocation11 + $0x108] sm:$0xff] }
 0x623   :  { %v1390_v53 = vadd.f32 %v1389_v3, %v1382_v46  ;;  %v3655_v55 = vadd.f32 %v1389_v3, %v1383_v47  ;;  %v3657_v2 = vadd.f32 %v1389_v3, %v1384_v48  ;;  %v3659_v56 = vadd.f32 %v1389_v3, %v1385_v49  ;;  %v1582_v47 = vld [vmem:[#allocation11 + $0x70] sm:$0xff]  ;;  %v1583_v48 = vld [vmem:[#allocation11 + $0x78] sm:$0xff]  ;;  %v1772_v3 = vld [vmem:[#allocation11 + $0x100] sm:$0xff] }
 0x624   :  { %v2836_v46 = vpack.c.bf16 %v1581_v42, %v1580_v41  ;;  %v2808_v49 = vpack.c.bf16 %v1600_v45, %v1599_v44  ;;  %v2840_v50 = vpack.c.bf16 %v1583_v48, %v1582_v47 }
 0x625   :  { %v1394_v57 = vmax.f32 %v1390_v53, 0.0  ;;  %v1395_v54 = vmax.f32 %v3655_v55, 0.0  ;;  %v1396_v52 = vmax.f32 %v3657_v2, 0.0  ;;  %v1397_v59 = vmax.f32 %v3659_v56, 0.0  ;;  %v1776_v55 = vld [vmem:[#allocation11 + $0x120] sm:$0xff] }
 0x626   :  { %v2844_v53 = vpack.c.bf16 %v1773_v51, %v1772_v3 }
 0x627   :  { %v2764_v58 = vpack.c.bf16 %v1395_v54, %v1394_v57  ;;  %v2768_v6 = vpack.c.bf16 %v1397_v59, %v1396_v52 }
 0x629   :  { %2765 = vmatprep.subr.bf16.mxu0 %v2764_v58  ;;  %2773 = vmatprep.subr.bf16.mxu1 %v2764_v58 }
 0x62a   :  { %2767 = vmatpush3.bf16.msra.mxu0 %v2764_v58  ;;  %2775 = vmatpush3.bf16.msra.mxu1 %v2764_v58  ;;  %v1775_v58 = vld [vmem:[#allocation11 + $0x118] sm:$0xff] }
 0x62b   :  { %2769 = vmatprep.subr.bf16.mxu0 %v2768_v6  ;;  %2777 = vmatprep.subr.bf16.mxu1 %v2768_v6 }
 0x62e   :  { %2771 = vmatpush3.bf16.msra.mxu0 %v2768_v6  ;;  %2779 = vmatpush3.bf16.msra.mxu1 %v2768_v6 }
 0x62f   :  { %2781 = vmatprep.subr.bf16.mxu1 %v2780_v8  ;;  %2813 = vmatprep.subr.bf16.mxu0 %v2812_v12 }
 0x631   :  { %2473 = vmatmul.mubr.msk.f32.vlgmr.msra.gmra.mrb[12].mxu0 %vm521_vm4, %v3430_v32  ;;  %2487 = vmatmul.mubr.msk.f32.vlgmr.msra.gmra.mrb[16].mxu1 %vm521_vm4, %v3432_v33  ;;  %v2820_v32 = vpack.c.bf16 %v1573_v63, %v1572_v21  ;;  %v1574_v33 = vld [vmem:[#allocation11 + $0x30] sm:$0xff]  ;;  %v2864_v21 = vpack.c.bf16 %v1783_v20, %v1782_v19  ;;  %v1784_v63 = vld [vmem:[#allocation11 + $0x160] sm:$0xff] }
 0x632   :  { %2783 = vmatpush3.bf16.msra.mxu1 %v2780_v8  ;;  %2489 = vmatprep.mubr.msk.f32.mxu1 %vm521_vm4, %v3446_v38  ;;  %v1575_v38 = vld [vmem:[#allocation11 + $0x38] sm:$0xff] }
 0x633   :  { %2785 = vmatprep.subr.bf16.mxu1 %v2784_v16  ;;  %2475 = vmatprep.mubr.msk.f32.mxu0 %vm521_vm4, %v3437_v34  ;;  %v1594_v34 = vld [vmem:[#allocation11 + $0xc8] sm:$0xff]  ;;  %v2824_v10 = vpack.c.bf16 %v1575_v38, %v1574_v33  ;;  %v509_v33 = vld [vmem:[#allocation7] sm:$0xff] }
 0x634   :  { %2815 = vmatpush3.bf16.msra.mxu0 %v2812_v12  ;;  %v1778_v12 = vld [vmem:[#allocation11 + $0x130] sm:$0xff]  ;;  %v510_v38 = vld [vmem:[#allocation7 + $0x8] sm:$0xff] }
 0x635   :  { %2490 = vmatmul.mubr.msk.f32.gmra.mrb[18].mxu1 %vm521_vm4, %v3459_v40  ;;  %2476 = vmatmul.mubr.msk.f32.gmra.mrb[14].mxu0 %vm521_vm4, %v3457_v39  ;;  %v2796_v40 = vpack.c.bf16 %v1594_v34, %v1593_v9  ;;  %v1596_v39 = vld [vmem:[#allocation11 + $0xd8] sm:$0xff]  ;;  %v2856_v15 = vpack.c.bf16 %v1779_v14, %v1778_v12  ;;  %v511_v9 = vld [vmem:[#allocation7 + $0x10] sm:$0xff] }
 0x636   :  { %2787 = vmatpush3.bf16.msra.mxu1 %v2784_v16  ;;  %2524 = vmatprep.mubr.f32.mxu1 %v1394_v57  ;;  %v2800_v35 = vpack.c.bf16 %v1596_v39, %v1595_v28  ;;  %v1774_v57 = vld [vmem:[#allocation11 + $0x110] sm:$0xff]  ;;  %v1780_v16 = vld [vmem:[#allocation11 + $0x140] sm:$0xff] }
 0x637   :  { %2789 = vmatprep.subr.bf16.mxu1 %v2788_v22  ;;  %2817 = vmatprep.subr.bf16.mxu0 %v2816_v5  ;;  %v2848_v62 = vpack.c.bf16 %v1775_v58, %v1774_v57  ;;  %v2860_v18 = vpack.c.bf16 %v1781_v17, %v1780_v16  ;;  %v512_v34 = vld [vmem:[#allocation7 + $0x18] sm:$0xff]  ;;  %v514_v28 = vld [vmem:[#allocation7 + $0x28] sm:$0xff] }
 0x638   :  { %2819 = vmatpush3.bf16.msra.mxu0 %v2816_v5  ;;  %v2880_v0 = vpack.c.bf16 %v512_v34, %v511_v9 }
 0x639   :  { %2821 = vmatprep.subr.bf16.mxu0 %v2820_v32 }
 0x63a   :  { %2791 = vmatpush3.bf16.msra.mxu1 %v2788_v22  ;;  %v1785_v22 = vld [vmem:[#allocation11 + $0x168] sm:$0xff] }
 0x63b   :  { %2793 = vmatprep.subr.bf16.mxu1 %v2792_v24  ;;  %v2868_v5 = vpack.c.bf16 %v1785_v22, %v1784_v63 }
 0x63c   :  { %2823 = vmatpush3.bf16.msra.mxu0 %v2820_v32  ;;  %v2872_v32 = vpack.c.bf16 %v1787_v23, %v1786_v13 }
 0x63d   :  { %2825 = vmatprep.subr.bf16.mxu0 %v2824_v10 }
 0x63e   :  { %2795 = vmatpush3.bf16.msra.mxu1 %v2792_v24  ;;  %v2876_v24 = vpack.c.bf16 %v510_v38, %v509_v33 }
 0x63f   :  { %2797 = vmatprep.subr.bf16.mxu1 %v2796_v40 }
 0x640   :  { %2827 = vmatpush3.bf16.msra.mxu0 %v2824_v10 }
 0x641   :  { %2829 = vmatprep.subr.bf16.mxu0 %v2828_v29 }
 0x642   :  { %2799 = vmatpush3.bf16.msra.mxu1 %v2796_v40  ;;  %v513_v40 = vld [vmem:[#allocation7 + $0x20] sm:$0xff] }
 0x643   :  { %2801 = vmatprep.subr.bf16.mxu1 %v2800_v35  ;;  %v2884_v30 = vpack.c.bf16 %v514_v28, %v513_v40 }
 0x644   :  { %2831 = vmatpush3.bf16.msra.mxu0 %v2828_v29 }
 0x645   :  { %2833 = vmatprep.subr.bf16.mxu0 %v2832_v37 }
 0x646   :  { %2803 = vmatpush3.bf16.msra.mxu1 %v2800_v35  ;;  %v516_v35 = vld [vmem:[#allocation7 + $0x38] sm:$0xff] }
 0x647   :  { %2805 = vmatprep.subr.bf16.mxu1 %v2804_v43  ;;  %v2888_v36 = vpack.c.bf16 %v516_v35, %v515_v31 }
 0x648   :  { %2835 = vmatpush3.bf16.msra.mxu0 %v2832_v37 }
 0x649   :  { %2837 = vmatprep.subr.bf16.mxu0 %v2836_v46 }
 0x64a   :  { %2807 = vmatpush3.bf16.msra.mxu1 %v2804_v43 }
 0x64b   :  { %2809 = vmatprep.subr.bf16.mxu1 %v2808_v49 }
 0x64c   :  { %2839 = vmatpush3.bf16.msra.mxu0 %v2836_v46 }
 0x64d   :  { %2841 = vmatprep.subr.bf16.mxu0 %v2840_v50 }
 0x64e   :  { %2811 = vmatpush3.bf16.msra.mxu1 %v2808_v49 }
 0x650   :  { %2843 = vmatpush3.bf16.msra.mxu0 %v2840_v50 }
 0x651   :  { %2525 = vmatmul.mubr.f32.vlgmr.msra.gmra.mrb[20].mxu1 %v1395_v54  ;;  %2845 = vmatprep.subr.bf16.mxu0 %v2844_v53  ;;  %v1777_v54 = vld [vmem:[#allocation11 + $0x128] sm:$0xff] }
 0x652   :  { %2527 = vmatprep.mubr.f32.mxu1 %v1396_v52  ;;  %v2852_v56 = vpack.c.bf16 %v1777_v54, %v1776_v55 }
 0x655   :  { %2528 = vmatmul.mubr.f32.gmra.mrb[22].mxu1 %v1397_v59 }
 0x704   :  { %v2474_v6 = vpop.f32.mrb[12].mxu0  ;;  %v2488_v60 = vpop.f32.mrb[16].mxu1 }
 0x705   :  { %v1464_v61 = vpop.f32.mrb[13].mxu0  ;;  %v1549_v4 = vpop.f32.mrb[17].mxu1 }
 0x706   :  { %2562 = vmatprep.mubr.f32.mxu0 %v1464_v61 }
 0x707   :  { %2563 = vmatmul.mubr.f32.vlgmr.msra.gmra.mrb[16].mxu0 %v2474_v6 }
 0x708   :  { %2847 = vmatpush3.bf16.msra.mxu0 %v2844_v53  ;;  %v2477_v2 = vpop.f32.mrb[14].mxu0  ;;  %v2491_v52 = vpop.f32.mrb[18].mxu1 }
 0x709   :  { %2849 = vmatprep.subr.bf16.mxu0 %v2848_v62  ;;  %v1474_v59 = vpop.f32.mrb[15].mxu0  ;;  %v1559_v8 = vpop.f32.mrb[19].mxu1 }
 0x70a   :  { %2565 = vmatprep.mubr.f32.mxu0 %v1474_v59 }
 0x70b   :  { %2566 = vmatmul.mubr.f32.gmra.mrb[18].mxu0 %v2477_v2 }
 0x70c   :  { %2851 = vmatpush3.bf16.msra.mxu0 %v2848_v62  ;;  %2600 = vmatprep.mubr.f32.mxu0 %v1549_v4 }
 0x70d   :  { %2853 = vmatprep.subr.bf16.mxu0 %v2852_v56 }
 0x710   :  { %2855 = vmatpush3.bf16.msra.mxu0 %v2852_v56 }
 0x711   :  { %2857 = vmatprep.subr.bf16.mxu0 %v2856_v15 }
 0x714   :  { %2859 = vmatpush3.bf16.msra.mxu0 %v2856_v15 }
 0x715   :  { %2861 = vmatprep.subr.bf16.mxu0 %v2860_v18 }
 0x718   :  { %2863 = vmatpush3.bf16.msra.mxu0 %v2860_v18 }
 0x719   :  { %2865 = vmatprep.subr.bf16.mxu0 %v2864_v21 }
 0x71c   :  { %2867 = vmatpush3.bf16.msra.mxu0 %v2864_v21 }
 0x71d   :  { %2869 = vmatprep.subr.bf16.mxu0 %v2868_v5 }
 0x720   :  { %2871 = vmatpush3.bf16.msra.mxu0 %v2868_v5 }
 0x721   :  { %2873 = vmatprep.subr.bf16.mxu0 %v2872_v32 }
 0x724   :  { %2875 = vmatpush3.bf16.msra.mxu0 %v2872_v32  ;;  %v2526_v10 = vpop.f32.mrb[20].mxu1 }
 0x725   :  { %v1667_v11 = vpop.f32.mrb[21].mxu1  ;;  %2877 = vmatprep.subr.bf16.mxu0 %v2876_v24 }
 0x727   :  { %2601 = vmatmul.mubr.f32.vlgmr.msra.gmra.mrb[16].mxu0 %v2488_v60 }
 0x728   :  { %2879 = vmatpush3.bf16.msra.mxu0 %v2876_v24  ;;  %v2529_v39 = vpop.f32.mrb[22].mxu1  ;;  %2603 = vmatprep.mubr.f32.mxu0 %v1559_v8 }
 0x729   :  { %v1677_v29 = vpop.f32.mrb[23].mxu1  ;;  %2881 = vmatprep.subr.bf16.mxu0 %v2880_v0 }
 0x72b   :  { %2604 = vmatmul.mubr.f32.gmra.mrb[18].mxu0 %v2491_v52 }
 0x72c   :  { %2883 = vmatpush3.bf16.msra.mxu0 %v2880_v0  ;;  %2622 = vmatprep.mubr.msk.f32.mxu0 %vm141_vm1, %v3403_v25 }
 0x72d   :  { %2885 = vmatprep.subr.bf16.mxu0 %v2884_v30 }
 0x730   :  { %2887 = vmatpush3.bf16.msra.mxu0 %v2884_v30 }
 0x731   :  { %2889 = vmatprep.subr.bf16.mxu0 %v2888_v36 }
 0x734   :  { %2891 = vmatpush3.bf16.msra.mxu0 %v2888_v36 }
 0x737   :  { %2623 = vmatmul.mubr.msk.f32.vlgmr.msra.gmra.mrb[16].mxu0 %vm141_vm1, %v3405_v26 }
 0x738   :  { %2625 = vmatprep.mubr.msk.f32.mxu0 %vm141_vm1, %v3407_v27 }
 0x73b   :  { %2626 = vmatmul.mubr.msk.f32.gmra.mrb[18].mxu0 %vm141_vm1, %v3409_v7 }
 0x80a   :  { %v2624_v1 = vpop.f32.mrb[16].mxu0 }
 0x80b   :  { %v2892_v37 = vadd.f32 %v2624_v1, %v2526_v10  ;;  %v1943_v41 = vpop.f32.mrb[17].mxu0 }
 0x80c   :  { %v2893_v42 = vadd.f32 %v1943_v41, %v1667_v11 }
 0x80d   :  { %1963 = vst [vmem:[#allocation14 + $0x8] sm:$0xff] %v2892_v37 }
 0x80e   :  { %1962 = vst [vmem:[#allocation14] sm:$0xff] %v2893_v42  ;;  %v2627_v25 = vpop.f32.mrb[18].mxu0 }
 0x80f   :  { %v2894_v43 = vadd.f32 %v2627_v25, %v2529_v39  ;;  %v1953_v44 = vpop.f32.mrb[19].mxu0 }
 0x810   :  { %v2895_v45 = vadd.f32 %v1953_v44, %v1677_v29 }
 0x811   :  { %1965 = vst [vmem:[#allocation14 + $0x18] sm:$0xff] %v2894_v43 }
 0x812   :  { %1964 = vst [vmem:[#allocation14 + $0x10] sm:$0xff] %v2895_v45 }
 0x813   :  { %3094 = shalt.err (!%p3091_p4)
}
 0x814   :  { %s3095_s0 = scalar_lea.hbm %s3725_s14, 512 }
 0x815   :  { %p3096_p5 = scmp.ne.s32.totalorder %s3725_s14, %s3095_s0  ;;  %p3099_p6 = scmp.lt.u32.totalorder %s3095_s0, %s3725_s14 }
 0x817   :  { %p3101_p7 = pnand %p3099_p6, %p3096_p5 }
 0x819   :  { %3104 = shalt.err (!%p3101_p7)
}
 0x81a   :  { %1977 = dma.vmem_to_hbm [thread:$0]  %s1972_s30, 512, %s3725_s14, [#allocation4], %s3119_s16, %s3119_s16, %s3120_s19  }
 0x81b   :  { %3113 = dma.done.wait [#allocation4], 512  }
 0x81c   :  { %3114 = vsyncadd [#allocation4], 4294966784 }
 0x81d   :  { %1981 = vsyncpa [#allocation3], 1 }
 0x81e   :  { %1982 = vsyncpa [#allocation6], 1 }
 0x81f   :  { %1983 = vsyncpa [#allocation9], 1 }
 0x820   :  { %1984 = vsyncpa [#allocation12], 1 }
 0x821   :  { %1985 = vsyncpa [#allocation4], 1 }

</bundles_post_ra>
